<compile_context>
chip_gen: v5e
topology: v5e:2x2
jax: 0.10.0
libtpu: 0.0.40
codegen_flags: <defaults>
</compile_context>

<pallas_src>
import functools
import math

import jax
import jax.numpy as jnp
from jax import lax
from jax.experimental import pallas as pl
from jax.experimental.pallas import tpu as pltpu

LN_EPS = 1e-12          # config.layer_norm_eps
IGNORE_INDEX = -100     # nn.CrossEntropyLoss default
_NEG_BIG = -1e30        # bias for padded vocab columns (never the max / never a label)


def _round_up(x, m):
    return ((x + m - 1) // m) * m


def _mlm_head_kernel(x_ref, labels_ref, wd_ref, bd_ref, gamma_ref, beta_ref,
                     wdec_ref, bdec_ref, *rest, write_logits):
    if write_logits:
        logits_ref, loss_ref, h_s, m_s, s_s, ll_s = rest
    else:
        loss_ref, h_s, m_s, s_s, ll_s = rest

    v = pl.program_id(1)
    nv = pl.num_programs(1)

    # ---- dense -> gelu -> LayerNorm: once per token tile (first vocab step only) ----
    @pl.when(v == 0)
    def _():
        x = x_ref[...]
        h = jnp.dot(x.astype(wd_ref.dtype), wd_ref[...],
                    preferred_element_type=jnp.float32)
        h = h + bd_ref[...].astype(jnp.float32)
        # exact (erf) gelu, matches torch.nn.functional.gelu default
        h = 0.5 * h * (1.0 + lax.erf(h * (1.0 / math.sqrt(2.0))))
        mean = jnp.mean(h, axis=-1, keepdims=True)
        var = jnp.mean(jnp.square(h - mean), axis=-1, keepdims=True)
        h = (h - mean) * lax.rsqrt(var + LN_EPS)
        h = h * gamma_ref[...].astype(jnp.float32) + beta_ref[...].astype(jnp.float32)
        h_s[...] = h.astype(h_s.dtype)            # cached for all vocab tiles
        m_s[...] = jnp.full_like(m_s, -jnp.inf)   # online-logsumexp running max
        s_s[...] = jnp.zeros_like(s_s)            # running sum-exp
        ll_s[...] = jnp.zeros_like(ll_s)          # label logit accumulator

    # ---- decoder projection for this vocab tile (bf16 MXU, f32 accumulate) ----
    logits = jnp.dot(h_s[...], wdec_ref[...], preferred_element_type=jnp.float32)
    logits = logits + bdec_ref[...].astype(jnp.float32)
    if write_logits:
        logits_ref[...] = logits.astype(logits_ref.dtype)

    # ---- online logsumexp across vocab tiles ----
    tn, tv = logits.shape
    m_prev = m_s[...]
    m_new = jnp.maximum(m_prev, jnp.max(logits, axis=-1, keepdims=True))
    s_s[...] = (s_s[...] * jnp.exp(m_prev - m_new)
                + jnp.sum(jnp.exp(logits - m_new), axis=-1, keepdims=True))
    m_s[...] = m_new

    # ---- label logit: only the vocab tile that owns the label contributes ----
    labels = labels_ref[...]                                     # (tn, 1) int32
    gidx = lax.broadcasted_iota(jnp.int32, (tn, tv), 1) + v * tv
    ll_s[...] += jnp.sum(jnp.where(gidx == labels, logits, 0.0),
                         axis=-1, keepdims=True)

    # ---- finalize: per-token NLL (ignored / padded tokens contribute 0) ----
    @pl.when(v == nv - 1)
    def _():
        lse = m_s[...] + jnp.log(s_s[...])
        valid = labels_ref[...] != IGNORE_INDEX
        loss_ref[...] = jnp.where(valid, lse - ll_s[...], 0.0).astype(loss_ref.dtype)


def mlm_head_forward(sequence_output, labels, params, *,
                     tn=256, tv=2048,
                     compute_dtype=jnp.bfloat16,
                     logits_dtype=None,
                     return_logits=True,
                     single_buffer_constants=True):
    """Forward pass of MlmHead. Returns {'loss': scalar, 'logits': (B,S,V) or None}."""
    B, S, H = sequence_output.shape
    V = params["decoder_w"].shape[1]
    N = B * S
    if logits_dtype is None:
        # Follow the activation dtype (bf16 inputs -> bf16 logits halves HBM writeback).
        logits_dtype = sequence_output.dtype

    # ---- tile selection (MXU-friendly, lane-dense outputs) + padding ----
    if N <= tn:
        tn = _round_up(N, 8)                    # one token tile, sublane aligned
    else:
        tn = max(8, (tn // 8) * 8)              # default 256 feeds the MXU fully
    N_pad = _round_up(N, tn)

    if V <= tv:
        tv = V                                  # single vocab tile (full-dim block)
        V_pad = V
    else:
        tv = max(128, (tv // 128) * 128)        # lane-aligned vocab tile (budgeted for v7x VMEM)
        V_pad = _round_up(V, tv)

    # ---- pack / cast operands ----
    x = sequence_output.reshape(N, H)
    lab = labels.reshape(N).astype(jnp.int32)
    if N_pad != N:
        x = jnp.pad(x, ((0, N_pad - N), (0, 0)))
        lab = jnp.pad(lab, (0, N_pad - N), constant_values=IGNORE_INDEX)
    lab2 = lab.reshape(N_pad, 1)

    wd = params["dense_w"].astype(compute_dtype)            # (H, H)
    bd = params["dense_b"].reshape(1, H).astype(jnp.float32)
    gamma = params["ln_gamma"].reshape(1, H).astype(jnp.float32)
    beta = params["ln_beta"].reshape(1, H).astype(jnp.float32)
    wdec = params["decoder_w"].astype(compute_dtype)        # (H, V)
    bdec = params["decoder_b"].reshape(1, V).astype(jnp.float32)
    if V_pad != V:
        wdec = jnp.pad(wdec, ((0, 0), (0, V_pad - V)))
        bdec = jnp.pad(bdec, ((0, 0), (0, V_pad - V)), constant_values=_NEG_BIG)

    grid = (N_pad // tn, V_pad // tv)
    wb = jnp.dtype(compute_dtype).itemsize
    cost = pl.CostEstimate(
        flops=int(2 * N_pad * H * H + 2 * N_pad * H * V_pad),
        transcendentals=int(N_pad * (V_pad + H)),            # exp (CE) + erf (gelu)
        bytes_accessed=int(
            x.size * x.dtype.itemsize + lab2.size * 4
            + H * H * wb + grid[0] * H * V_pad * wb + V_pad * 4 + 3 * H * 4
            + (N_pad * V_pad * jnp.dtype(logits_dtype).itemsize if return_logits else 0)
            + N_pad * 4))

    def build_call(single_buf):
        # Constant-index operands never change block; single-buffer them to save
        # VMEM.  Falls back to default double-buffering if this JAX build does not
        # accept pl.Buffered(1) on pallas_call BlockSpecs.
        if single_buf:
            def const_spec(shape):
                return pl.BlockSpec(shape, lambda i, v: (0, 0),
                                    pipeline_mode=pl.Buffered(1))
        else:
            def const_spec(shape):
                return pl.BlockSpec(shape, lambda i, v: (0, 0))

        in_specs = [
            pl.BlockSpec((tn, H), lambda i, v: (i, 0)),   # x tokens (reused across v)
            pl.BlockSpec((tn, 1), lambda i, v: (i, 0)),   # labels
            const_spec((H, H)),                           # dense weight
            const_spec((1, H)),                           # dense bias
            const_spec((1, H)),                           # LN gamma
            const_spec((1, H)),                           # LN beta
            pl.BlockSpec((H, tv), lambda i, v: (0, v)),   # decoder weight tile (pipelined over v)
            pl.BlockSpec((1, tv), lambda i, v: (0, v)),   # decoder bias tile
        ]
        out_shapes, out_specs = [], []
        if return_logits:
            out_shapes.append(jax.ShapeDtypeStruct((N_pad, V_pad), logits_dtype))
            out_specs.append(pl.BlockSpec((tn, tv), lambda i, v: (i, v)))
        out_shapes.append(jax.ShapeDtypeStruct((N_pad, 1), jnp.float32))   # per-token loss
        out_specs.append(pl.BlockSpec((tn, 1), lambda i, v: (i, 0)))

        return pl.pallas_call(
            functools.partial(_mlm_head_kernel, write_logits=return_logits),
            out_shape=tuple(out_shapes),
            grid_spec=pltpu.PrefetchScalarGridSpec(
                num_scalar_prefetch=0,
                grid=grid,
                in_specs=in_specs,
                out_specs=out_specs,
                scratch_shapes=[
                    pltpu.VMEM((tn, H), compute_dtype),   # post-LayerNorm activations
                    pltpu.VMEM((tn, 1), jnp.float32),     # running max
                    pltpu.VMEM((tn, 1), jnp.float32),     # running sum-exp
                    pltpu.VMEM((tn, 1), jnp.float32),     # label logit
                ]),
            compiler_params=pltpu.CompilerParams(
                dimension_semantics=("parallel", "arbitrary"),   # tokens megacore-shardable (v7x)
                vmem_limit_bytes=48 * 1024 * 1024),              # budgeted for v7x's 64 MiB VMEM
            cost_estimate=cost,
        )

    args = (x, lab2, wd, bd, gamma, beta, wdec, bdec)
    if single_buffer_constants:
        try:
            outs = build_call(True)(*args)
        except Exception:   # pl.Buffered(1) not supported here -> default buffering
            outs = build_call(False)(*args)
    else:
        outs = build_call(False)(*args)

    if return_logits:
        logits_pad, per_token_loss = outs
        logits = logits_pad[:N, :V].reshape(B, S, V)
    else:
        (per_token_loss,) = outs
        logits = None

    num_valid = jnp.sum((labels.reshape(-1) != IGNORE_INDEX).astype(jnp.float32))
    # CrossEntropyLoss(reduction='mean'); NaN when every label is ignored (matches torch).
    mlm_loss = jnp.sum(per_token_loss[:N, 0]) / num_valid
    return {"loss": mlm_loss, "logits": logits}


def mlm_head_reference(sequence_output, labels, params):
    """Pure-JAX f32 reference matching the PyTorch module."""
    x = sequence_output.astype(jnp.float32)
    h = x @ params["dense_w"] + params["dense_b"]
    h = 0.5 * h * (1.0 + lax.erf(h / math.sqrt(2.0)))
    mean = h.mean(-1, keepdims=True)
    var = ((h - mean) ** 2).mean(-1, keepdims=True)
    h = (h - mean) / jnp.sqrt(var + LN_EPS) * params["ln_gamma"] + params["ln_beta"]
    logits = h @ params["decoder_w"] + params["decoder_b"]
    V = logits.shape[-1]
    lg = logits.reshape(-1, V)
    lab = labels.reshape(-1)
    valid = lab != IGNORE_INDEX
    lse = jax.scipy.special.logsumexp(lg, axis=-1)
    ll = jnp.take_along_axis(lg, jnp.where(valid, lab, 0)[:, None], axis=-1)[:, 0]
    loss = jnp.sum(jnp.where(valid, lse - ll, 0.0)) / jnp.sum(valid)
    return {"loss": loss, "logits": logits}


def init_params(key, hidden_size, vocab_size):
    k1, k2, k3 = jax.random.split(key, 3)
    return {
        "dense_w": 0.02 * jax.random.normal(k1, (hidden_size, hidden_size), jnp.float32),
        "dense_b": 0.01 * jax.random.normal(k2, (hidden_size,), jnp.float32),
        "ln_gamma": jnp.ones((hidden_size,), jnp.float32),
        "ln_beta": jnp.zeros((hidden_size,), jnp.float32),
        "decoder_w": 0.02 * jax.random.normal(k3, (hidden_size, vocab_size), jnp.float32),
        "decoder_b": jnp.zeros((vocab_size,), jnp.float32),   # self.bias = zeros(vocab)
    }


if __name__ == "__main__":
    B, S, H, V = 2, 8, 32, 64
    key = jax.random.PRNGKey(0)
    kx, kl, kp = jax.random.split(key, 3)

    sequence_output = jax.random.normal(kx, (B, S, H), jnp.float32)
    labels = jax.random.randint(kl, (B, S), 0, V, jnp.int32)
    labels = labels.at[0, 0].set(IGNORE_INDEX)   # exercise ignore_index handling
    params = init_params(kp, H, V)

    out = mlm_head_forward(sequence_output, labels, params)
    jax.block_until_ready(out["loss"])
    jax.block_until_ready(out["logits"])

    assert out["logits"].shape == (B, S, V)
    assert out["loss"].shape == ()
    assert bool(jnp.isfinite(out["loss"]))

    ref = mlm_head_reference(sequence_output, labels, params)
    assert jnp.allclose(out["loss"], ref["loss"], rtol=5e-2, atol=5e-2), (
        float(out["loss"]), float(ref["loss"]))
    assert jnp.allclose(out["logits"].astype(jnp.float32), ref["logits"],
                        rtol=5e-2, atol=5e-2)
    print("KERNEL_OK")
</pallas_src>

<mosaic_0001>
module attributes {stable_mosaic.version = 11 : i64} {
  func.func @_mlm_head_kernel(%arg0: i32, %arg1: i32, %arg2: memref<16x32xf32, #tpu.memory_space<vmem>>, %arg3: memref<16x1xi32, #tpu.memory_space<vmem>>, %arg4: memref<32x32xbf16, #tpu.memory_space<vmem>>, %arg5: memref<1x32xf32, #tpu.memory_space<vmem>>, %arg6: memref<1x32xf32, #tpu.memory_space<vmem>>, %arg7: memref<1x32xf32, #tpu.memory_space<vmem>>, %arg8: memref<32x64xbf16, #tpu.memory_space<vmem>>, %arg9: memref<1x64xf32, #tpu.memory_space<vmem>>, %arg10: memref<16x64xf32, #tpu.memory_space<vmem>>, %arg11: memref<16x1xf32, #tpu.memory_space<vmem>>, %arg12: memref<16x32xbf16, #tpu.memory_space<vmem>>, %arg13: memref<16x1xf32, #tpu.memory_space<vmem>>, %arg14: memref<16x1xf32, #tpu.memory_space<vmem>>, %arg15: memref<16x1xf32, #tpu.memory_space<vmem>>) attributes {dimension_semantics = [#tpu.dimension_semantics<parallel>, #tpu.dimension_semantics<arbitrary>], iteration_bounds = array<i64: 1, 1>, scalar_prefetch = 0 : i64, scratch_operands = 4 : i64, tpu.core_type = #tpu.core_type<tc>, window_params = [{transform_indices = @transform_0, window_bounds = array<i64: 16, 32>}, {transform_indices = @transform_1, window_bounds = array<i64: 16, 1>}, {pipeline_mode = #tpu.pipeline_mode<synchronous>, transform_indices = @transform_2, window_bounds = array<i64: 32, 32>}, {pipeline_mode = #tpu.pipeline_mode<synchronous>, transform_indices = @transform_3, window_bounds = array<i64: 1, 32>}, {pipeline_mode = #tpu.pipeline_mode<synchronous>, transform_indices = @transform_4, window_bounds = array<i64: 1, 32>}, {pipeline_mode = #tpu.pipeline_mode<synchronous>, transform_indices = @transform_5, window_bounds = array<i64: 1, 32>}, {transform_indices = @transform_6, window_bounds = array<i64: 32, 64>}, {transform_indices = @transform_7, window_bounds = array<i64: 1, 64>}, {transform_indices = @transform_8, window_bounds = array<i64: 16, 64>}, {transform_indices = @transform_9, window_bounds = array<i64: 16, 1>}]} {
    %c0_i32 = arith.constant 0 : i32
    %0 = arith.cmpi eq, %arg1, %c0_i32 : i32
    %1 = arith.extui %0 : i1 to i32
    %c0_i32_0 = arith.constant 0 : i32
    %2 = arith.cmpi ne, %1, %c0_i32_0 : i32
    scf.if %2 {
      %c0_28 = arith.constant 0 : index
      %c0_29 = arith.constant 0 : index
      %43 = vector.load %arg2[%c0_28, %c0_29] : memref<16x32xf32, #tpu.memory_space<vmem>>, vector<16x32xf32>
      %44 = arith.truncf %43 : vector<16x32xf32> to vector<16x32xbf16>
      %c0_30 = arith.constant 0 : index
      %c0_31 = arith.constant 0 : index
      %45 = vector.load %arg4[%c0_30, %c0_31] : memref<32x32xbf16, #tpu.memory_space<vmem>>, vector<32x32xbf16>
      %cst_32 = arith.constant dense<0.000000e+00> : vector<16x32xf32>
      %46 = tpu.matmul %44, %45, %cst_32 {dimension_numbers = #tpu.dot_dimension_numbers<[1], [0], [0], [1], [0, 0, 1, 1], [], []>} : vector<16x32xbf16>, vector<32x32xbf16>, vector<16x32xf32> -> vector<16x32xf32>
      %c0_33 = arith.constant 0 : index
      %c0_34 = arith.constant 0 : index
      %47 = vector.load %arg5[%c0_33, %c0_34] : memref<1x32xf32, #tpu.memory_space<vmem>>, vector<1x32xf32>
      %48 = vector.broadcast %47 : vector<1x32xf32> to vector<16x32xf32>
      %49 = arith.addf %46, %48 : vector<16x32xf32>
      %cst_35 = arith.constant 5.000000e-01 : f32
      %50 = vector.broadcast %cst_35 : f32 to vector<16x32xf32>
      %51 = arith.mulf %50, %49 : vector<16x32xf32>
      %cst_36 = arith.constant 0.707106769 : f32
      %52 = vector.broadcast %cst_36 : f32 to vector<16x32xf32>
      %53 = arith.mulf %49, %52 : vector<16x32xf32>
      %54 = math.erf %53 : vector<16x32xf32>
      %cst_37 = arith.constant 1.000000e+00 : f32
      %55 = vector.broadcast %cst_37 : f32 to vector<16x32xf32>
      %56 = arith.addf %55, %54 : vector<16x32xf32>
      %57 = arith.mulf %51, %56 : vector<16x32xf32>
      %cst_38 = arith.constant dense<0.000000e+00> : vector<16xf32>
      %58 = vector.multi_reduction <add>, %57, %cst_38 [1] : vector<16x32xf32> to vector<16xf32>
      %59 = vector.shape_cast %58 : vector<16xf32> to vector<16x1xf32>
      %cst_39 = arith.constant 3.200000e+01 : f32
      %60 = vector.broadcast %cst_39 : f32 to vector<16x1xf32>
      %61 = arith.divf %59, %60 : vector<16x1xf32>
      %62 = vector.broadcast %61 : vector<16x1xf32> to vector<16x32xf32>
      %63 = arith.subf %57, %62 : vector<16x32xf32>
      %64 = arith.mulf %63, %63 : vector<16x32xf32>
      %cst_40 = arith.constant dense<0.000000e+00> : vector<16xf32>
      %65 = vector.multi_reduction <add>, %64, %cst_40 [1] : vector<16x32xf32> to vector<16xf32>
      %66 = vector.shape_cast %65 : vector<16xf32> to vector<16x1xf32>
      %cst_41 = arith.constant 3.200000e+01 : f32
      %67 = vector.broadcast %cst_41 : f32 to vector<16x1xf32>
      %68 = arith.divf %66, %67 : vector<16x1xf32>
      %69 = vector.broadcast %61 : vector<16x1xf32> to vector<16x32xf32>
      %70 = arith.subf %57, %69 : vector<16x32xf32>
      %cst_42 = arith.constant 9.99999996E-13 : f32
      %71 = vector.broadcast %cst_42 : f32 to vector<16x1xf32>
      %72 = arith.addf %68, %71 : vector<16x1xf32>
      %73 = math.rsqrt %72 : vector<16x1xf32>
      %74 = vector.broadcast %73 : vector<16x1xf32> to vector<16x32xf32>
      %75 = arith.mulf %70, %74 : vector<16x32xf32>
      %c0_43 = arith.constant 0 : index
      %c0_44 = arith.constant 0 : index
      %76 = vector.load %arg6[%c0_43, %c0_44] : memref<1x32xf32, #tpu.memory_space<vmem>>, vector<1x32xf32>
      %77 = vector.broadcast %76 : vector<1x32xf32> to vector<16x32xf32>
      %78 = arith.mulf %75, %77 : vector<16x32xf32>
      %c0_45 = arith.constant 0 : index
      %c0_46 = arith.constant 0 : index
      %79 = vector.load %arg7[%c0_45, %c0_46] : memref<1x32xf32, #tpu.memory_space<vmem>>, vector<1x32xf32>
      %80 = vector.broadcast %79 : vector<1x32xf32> to vector<16x32xf32>
      %81 = arith.addf %78, %80 : vector<16x32xf32>
      %82 = arith.truncf %81 : vector<16x32xf32> to vector<16x32xbf16>
      %c0_47 = arith.constant 0 : index
      %c0_48 = arith.constant 0 : index
      %83 = vector.load %arg12[%c0_47, %c0_48] : memref<16x32xbf16, #tpu.memory_space<vmem>>, vector<16x32xbf16>
      tpu.vector_store %arg12[%c0_47, %c0_48], %82 {strides = array<i32>} : memref<16x32xbf16, #tpu.memory_space<vmem>>, vector<16x32xbf16>,
      %cst_49 = arith.constant 0xFF800000 : f32
      %84 = vector.broadcast %cst_49 : f32 to vector<16x1xf32>
      %c0_50 = arith.constant 0 : index
      %c0_51 = arith.constant 0 : index
      %85 = vector.load %arg13[%c0_50, %c0_51] : memref<16x1xf32, #tpu.memory_space<vmem>>, vector<16x1xf32>
      tpu.vector_store %arg13[%c0_50, %c0_51], %84 {strides = array<i32>} : memref<16x1xf32, #tpu.memory_space<vmem>>, vector<16x1xf32>,
      %cst_52 = arith.constant 0.000000e+00 : f32
      %86 = vector.broadcast %cst_52 : f32 to vector<16x1xf32>
      %c0_53 = arith.constant 0 : index
      %c0_54 = arith.constant 0 : index
      %87 = vector.load %arg14[%c0_53, %c0_54] : memref<16x1xf32, #tpu.memory_space<vmem>>, vector<16x1xf32>
      tpu.vector_store %arg14[%c0_53, %c0_54], %86 {strides = array<i32>} : memref<16x1xf32, #tpu.memory_space<vmem>>, vector<16x1xf32>,
      %cst_55 = arith.constant 0.000000e+00 : f32
      %88 = vector.broadcast %cst_55 : f32 to vector<16x1xf32>
      %c0_56 = arith.constant 0 : index
      %c0_57 = arith.constant 0 : index
      %89 = vector.load %arg15[%c0_56, %c0_57] : memref<16x1xf32, #tpu.memory_space<vmem>>, vector<16x1xf32>
      tpu.vector_store %arg15[%c0_56, %c0_57], %88 {strides = array<i32>} : memref<16x1xf32, #tpu.memory_space<vmem>>, vector<16x1xf32>,
    } else {
    }
    %c0 = arith.constant 0 : index
    %c0_1 = arith.constant 0 : index
    %3 = vector.load %arg12[%c0, %c0_1] : memref<16x32xbf16, #tpu.memory_space<vmem>>, vector<16x32xbf16>
    %c0_2 = arith.constant 0 : index
    %c0_3 = arith.constant 0 : index
    %4 = vector.load %arg8[%c0_2, %c0_3] : memref<32x64xbf16, #tpu.memory_space<vmem>>, vector<32x64xbf16>
    %cst = arith.constant dense<0.000000e+00> : vector<16x64xf32>
    %5 = tpu.matmul %3, %4, %cst {dimension_numbers = #tpu.dot_dimension_numbers<[1], [0], [0], [1], [0, 0, 1, 1], [], []>} : vector<16x32xbf16>, vector<32x64xbf16>, vector<16x64xf32> -> vector<16x64xf32>
    %c0_4 = arith.constant 0 : index
    %c0_5 = arith.constant 0 : index
    %6 = vector.load %arg9[%c0_4, %c0_5] : memref<1x64xf32, #tpu.memory_space<vmem>>, vector<1x64xf32>
    %7 = vector.broadcast %6 : vector<1x64xf32> to vector<16x64xf32>
    %8 = arith.addf %5, %7 : vector<16x64xf32>
    %c0_6 = arith.constant 0 : index
    %c0_7 = arith.constant 0 : index
    %9 = vector.load %arg10[%c0_6, %c0_7] : memref<16x64xf32, #tpu.memory_space<vmem>>, vector<16x64xf32>
    tpu.vector_store %arg10[%c0_6, %c0_7], %8 {strides = array<i32>} : memref<16x64xf32, #tpu.memory_space<vmem>>, vector<16x64xf32>,
    %c0_8 = arith.constant 0 : index
    %c0_9 = arith.constant 0 : index
    %10 = vector.load %arg13[%c0_8, %c0_9] : memref<16x1xf32, #tpu.memory_space<vmem>>, vector<16x1xf32>
    %cst_10 = arith.constant dense<0xFF800000> : vector<16xf32>
    %11 = vector.multi_reduction <maximumf>, %8, %cst_10 [1] : vector<16x64xf32> to vector<16xf32>
    %12 = vector.shape_cast %11 : vector<16xf32> to vector<16x1xf32>
    %13 = arith.maximumf %10, %12 : vector<16x1xf32>
    %c0_11 = arith.constant 0 : index
    %c0_12 = arith.constant 0 : index
    %14 = vector.load %arg14[%c0_11, %c0_12] : memref<16x1xf32, #tpu.memory_space<vmem>>, vector<16x1xf32>
    %15 = arith.subf %10, %13 : vector<16x1xf32>
    %16 = math.exp %15 : vector<16x1xf32>
    %17 = arith.mulf %14, %16 : vector<16x1xf32>
    %18 = vector.broadcast %13 : vector<16x1xf32> to vector<16x64xf32>
    %19 = arith.subf %8, %18 : vector<16x64xf32>
    %20 = math.exp %19 : vector<16x64xf32>
    %cst_13 = arith.constant dense<0.000000e+00> : vector<16xf32>
    %21 = vector.multi_reduction <add>, %20, %cst_13 [1] : vector<16x64xf32> to vector<16xf32>
    %22 = vector.shape_cast %21 : vector<16xf32> to vector<16x1xf32>
    %23 = arith.addf %17, %22 : vector<16x1xf32>
    %c0_14 = arith.constant 0 : index
    %c0_15 = arith.constant 0 : index
    %24 = vector.load %arg14[%c0_14, %c0_15] : memref<16x1xf32, #tpu.memory_space<vmem>>, vector<16x1xf32>
    tpu.vector_store %arg14[%c0_14, %c0_15], %23 {strides = array<i32>} : memref<16x1xf32, #tpu.memory_space<vmem>>, vector<16x1xf32>,
    %c0_16 = arith.constant 0 : index
    %c0_17 = arith.constant 0 : index
    %25 = vector.load %arg13[%c0_16, %c0_17] : memref<16x1xf32, #tpu.memory_space<vmem>>, vector<16x1xf32>
    tpu.vector_store %arg13[%c0_16, %c0_17], %13 {strides = array<i32>} : memref<16x1xf32, #tpu.memory_space<vmem>>, vector<16x1xf32>,
    %c0_18 = arith.constant 0 : index
    %c0_19 = arith.constant 0 : index
    %26 = vector.load %arg3[%c0_18, %c0_19] : memref<16x1xi32, #tpu.memory_space<vmem>>, vector<16x1xi32>
    %27 = tpu.iota {dimensions = array<i32: 1>} : vector<16x64xi32>
    %c64_i32 = arith.constant 64 : i32
    %28 = arith.muli %arg1, %c64_i32 : i32
    %29 = vector.broadcast %28 : i32 to vector<16x64xi32>
    %30 = arith.addi %27, %29 : vector<16x64xi32>
    %c0_20 = arith.constant 0 : index
    %c0_21 = arith.constant 0 : index
    %31 = vector.load %arg15[%c0_20, %c0_21] : memref<16x1xf32, #tpu.memory_space<vmem>>, vector<16x1xf32>
    %32 = vector.broadcast %26 : vector<16x1xi32> to vector<16x64xi32>
    %33 = arith.cmpi eq, %30, %32 : vector<16x64xi32>
    %cst_22 = arith.constant 0.000000e+00 : f32
    %34 = vector.broadcast %cst_22 : f32 to vector<16x64xf32>
    %35 = arith.select %33, %8, %34 : vector<16x64xi1>, vector<16x64xf32>
    %cst_23 = arith.constant dense<0.000000e+00> : vector<16xf32>
    %36 = vector.multi_reduction <add>, %35, %cst_23 [1] : vector<16x64xf32> to vector<16xf32>
    %37 = vector.shape_cast %36 : vector<16xf32> to vector<16x1xf32>
    %38 = arith.addf %31, %37 : vector<16x1xf32>
    %c0_24 = arith.constant 0 : index
    %c0_25 = arith.constant 0 : index
    %39 = vector.load %arg15[%c0_24, %c0_25] : memref<16x1xf32, #tpu.memory_space<vmem>>, vector<16x1xf32>
    tpu.vector_store %arg15[%c0_24, %c0_25], %38 {strides = array<i32>} : memref<16x1xf32, #tpu.memory_space<vmem>>, vector<16x1xf32>,
    %c0_i32_26 = arith.constant 0 : i32
    %40 = arith.cmpi eq, %arg1, %c0_i32_26 : i32
    %41 = arith.extui %40 : i1 to i32
    %c0_i32_27 = arith.constant 0 : i32
    %42 = arith.cmpi ne, %41, %c0_i32_27 : i32
    scf.if %42 {
      %c0_28 = arith.constant 0 : index
      %c0_29 = arith.constant 0 : index
      %43 = vector.load %arg13[%c0_28, %c0_29] : memref<16x1xf32, #tpu.memory_space<vmem>>, vector<16x1xf32>
      %c0_30 = arith.constant 0 : index
      %c0_31 = arith.constant 0 : index
      %44 = vector.load %arg14[%c0_30, %c0_31] : memref<16x1xf32, #tpu.memory_space<vmem>>, vector<16x1xf32>
      %45 = math.log %44 : vector<16x1xf32>
      %46 = arith.addf %43, %45 : vector<16x1xf32>
      %c0_32 = arith.constant 0 : index
      %c0_33 = arith.constant 0 : index
      %47 = vector.load %arg3[%c0_32, %c0_33] : memref<16x1xi32, #tpu.memory_space<vmem>>, vector<16x1xi32>
      %c-100_i32 = arith.constant -100 : i32
      %48 = vector.broadcast %c-100_i32 : i32 to vector<16x1xi32>
      %49 = arith.cmpi ne, %47, %48 : vector<16x1xi32>
      %c0_34 = arith.constant 0 : index
      %c0_35 = arith.constant 0 : index
      %50 = vector.load %arg15[%c0_34, %c0_35] : memref<16x1xf32, #tpu.memory_space<vmem>>, vector<16x1xf32>
      %51 = arith.subf %46, %50 : vector<16x1xf32>
      %cst_36 = arith.constant 0.000000e+00 : f32
      %52 = vector.broadcast %cst_36 : f32 to vector<16x1xf32>
      %53 = arith.select %49, %51, %52 : vector<16x1xi1>, vector<16x1xf32>
      %c0_37 = arith.constant 0 : index
      %c0_38 = arith.constant 0 : index
      %54 = vector.load %arg11[%c0_37, %c0_38] : memref<16x1xf32, #tpu.memory_space<vmem>>, vector<16x1xf32>
      tpu.vector_store %arg11[%c0_37, %c0_38], %53 {strides = array<i32>} : memref<16x1xf32, #tpu.memory_space<vmem>>, vector<16x1xf32>,
    } else {
    }
    return
  }
  func.func @transform_0(%arg0: i32, %arg1: i32) -> (i32, i32) {
    %c0_i32 = arith.constant 0 : i32
    %c0_i32_0 = arith.constant 0 : i32
    return %arg0, %c0_i32 : i32, i32
  }
  func.func @transform_1(%arg0: i32, %arg1: i32) -> (i32, i32) {
    %c0_i32 = arith.constant 0 : i32
    %c0_i32_0 = arith.constant 0 : i32
    return %arg0, %c0_i32 : i32, i32
  }
  func.func @transform_2(%arg0: i32, %arg1: i32) -> (i32, i32) {
    %c0_i32 = arith.constant 0 : i32
    %c0_i32_0 = arith.constant 0 : i32
    %c0_i32_1 = arith.constant 0 : i32
    return %c0_i32, %c0_i32_0 : i32, i32
  }
  func.func @transform_3(%arg0: i32, %arg1: i32) -> (i32, i32) {
    %c0_i32 = arith.constant 0 : i32
    %c0_i32_0 = arith.constant 0 : i32
    %c0_i32_1 = arith.constant 0 : i32
    return %c0_i32, %c0_i32_0 : i32, i32
  }
  func.func @transform_4(%arg0: i32, %arg1: i32) -> (i32, i32) {
    %c0_i32 = arith.constant 0 : i32
    %c0_i32_0 = arith.constant 0 : i32
    %c0_i32_1 = arith.constant 0 : i32
    return %c0_i32, %c0_i32_0 : i32, i32
  }
  func.func @transform_5(%arg0: i32, %arg1: i32) -> (i32, i32) {
    %c0_i32 = arith.constant 0 : i32
    %c0_i32_0 = arith.constant 0 : i32
    %c0_i32_1 = arith.constant 0 : i32
    return %c0_i32, %c0_i32_0 : i32, i32
  }
  func.func @transform_6(%arg0: i32, %arg1: i32) -> (i32, i32) {
    %c0_i32 = arith.constant 0 : i32
    %c0_i32_0 = arith.constant 0 : i32
    return %c0_i32, %arg1 : i32, i32
  }
  func.func @transform_7(%arg0: i32, %arg1: i32) -> (i32, i32) {
    %c0_i32 = arith.constant 0 : i32
    %c0_i32_0 = arith.constant 0 : i32
    return %c0_i32, %arg1 : i32, i32
  }
  func.func @transform_8(%arg0: i32, %arg1: i32) -> (i32, i32) {
    %c0_i32 = arith.constant 0 : i32
    return %arg0, %arg1 : i32, i32
  }
  func.func @transform_9(%arg0: i32, %arg1: i32) -> (i32, i32) {
    %c0_i32 = arith.constant 0 : i32
    %c0_i32_0 = arith.constant 0 : i32
    return %arg0, %c0_i32 : i32, i32
  }
}

module attributes {stable_mosaic.version = 11 : i64} {
  func.func @_mlm_head_kernel(%arg0: i32, %arg1: i32, %arg2: memref<16x32xf32, #tpu.memory_space<vmem>>, %arg3: memref<16x1xi32, #tpu.memory_space<vmem>>, %arg4: memref<32x32xbf16, #tpu.memory_space<vmem>>, %arg5: memref<1x32xf32, #tpu.memory_space<vmem>>, %arg6: memref<1x32xf32, #tpu.memory_space<vmem>>, %arg7: memref<1x32xf32, #tpu.memory_space<vmem>>, %arg8: memref<32x64xbf16, #tpu.memory_space<vmem>>, %arg9: memref<1x64xf32, #tpu.memory_space<vmem>>, %arg10: memref<16x64xf32, #tpu.memory_space<vmem>>, %arg11: memref<16x1xf32, #tpu.memory_space<vmem>>, %arg12: memref<16x32xbf16, #tpu.memory_space<vmem>>, %arg13: memref<16x1xf32, #tpu.memory_space<vmem>>, %arg14: memref<16x1xf32, #tpu.memory_space<vmem>>, %arg15: memref<16x1xf32, #tpu.memory_space<vmem>>) attributes {dimension_semantics = [#tpu.dimension_semantics<parallel>, #tpu.dimension_semantics<arbitrary>], iteration_bounds = array<i64: 1, 1>, scalar_prefetch = 0 : i64, scratch_operands = 4 : i64, tpu.core_type = #tpu.core_type<tc>, window_params = [{transform_indices = @transform_0, window_bounds = array<i64: 16, 32>}, {transform_indices = @transform_1, window_bounds = array<i64: 16, 1>}, {pipeline_mode = #tpu.pipeline_mode<synchronous>, transform_indices = @transform_2, window_bounds = array<i64: 32, 32>}, {pipeline_mode = #tpu.pipeline_mode<synchronous>, transform_indices = @transform_3, window_bounds = array<i64: 1, 32>}, {pipeline_mode = #tpu.pipeline_mode<synchronous>, transform_indices = @transform_4, window_bounds = array<i64: 1, 32>}, {pipeline_mode = #tpu.pipeline_mode<synchronous>, transform_indices = @transform_5, window_bounds = array<i64: 1, 32>}, {transform_indices = @transform_6, window_bounds = array<i64: 32, 64>}, {transform_indices = @transform_7, window_bounds = array<i64: 1, 64>}, {transform_indices = @transform_8, window_bounds = array<i64: 16, 64>}, {transform_indices = @transform_9, window_bounds = array<i64: 16, 1>}]} {
    %c0_i32 = arith.constant 0 : i32
    %0 = arith.cmpi eq, %arg1, %c0_i32 : i32
    %1 = arith.extui %0 : i1 to i32
    %c0_i32_0 = arith.constant 0 : i32
    %2 = arith.cmpi ne, %1, %c0_i32_0 : i32
    scf.if %2 {
      %c0_28 = arith.constant 0 : index
      %c0_29 = arith.constant 0 : index
      %43 = vector.load %arg2[%c0_28, %c0_29] : memref<16x32xf32, #tpu.memory_space<vmem>>, vector<16x32xf32>
      %44 = arith.truncf %43 : vector<16x32xf32> to vector<16x32xbf16>
      %c0_30 = arith.constant 0 : index
      %c0_31 = arith.constant 0 : index
      %45 = vector.load %arg4[%c0_30, %c0_31] : memref<32x32xbf16, #tpu.memory_space<vmem>>, vector<32x32xbf16>
      %cst_32 = arith.constant dense<0.000000e+00> : vector<16x32xf32>
      %46 = tpu.matmul %44, %45, %cst_32 {dimension_numbers = #tpu.dot_dimension_numbers<[1], [0], [0], [1], [0, 0, 1, 1], [], []>} : vector<16x32xbf16>, vector<32x32xbf16>, vector<16x32xf32> -> vector<16x32xf32>
      %c0_33 = arith.constant 0 : index
      %c0_34 = arith.constant 0 : index
      %47 = vector.load %arg5[%c0_33, %c0_34] : memref<1x32xf32, #tpu.memory_space<vmem>>, vector<1x32xf32>
      %48 = vector.broadcast %47 : vector<1x32xf32> to vector<16x32xf32>
      %49 = arith.addf %46, %48 : vector<16x32xf32>
      %cst_35 = arith.constant 5.000000e-01 : f32
      %50 = vector.broadcast %cst_35 : f32 to vector<16x32xf32>
      %51 = arith.mulf %50, %49 : vector<16x32xf32>
      %cst_36 = arith.constant 0.707106769 : f32
      %52 = vector.broadcast %cst_36 : f32 to vector<16x32xf32>
      %53 = arith.mulf %49, %52 : vector<16x32xf32>
      %54 = math.erf %53 : vector<16x32xf32>
      %cst_37 = arith.constant 1.000000e+00 : f32
      %55 = vector.broadcast %cst_37 : f32 to vector<16x32xf32>
      %56 = arith.addf %55, %54 : vector<16x32xf32>
      %57 = arith.mulf %51, %56 : vector<16x32xf32>
      %cst_38 = arith.constant dense<0.000000e+00> : vector<16xf32>
      %58 = vector.multi_reduction <add>, %57, %cst_38 [1] : vector<16x32xf32> to vector<16xf32>
      %59 = vector.shape_cast %58 : vector<16xf32> to vector<16x1xf32>
      %cst_39 = arith.constant 3.200000e+01 : f32
      %60 = vector.broadcast %cst_39 : f32 to vector<16x1xf32>
      %61 = arith.divf %59, %60 : vector<16x1xf32>
      %62 = vector.broadcast %61 : vector<16x1xf32> to vector<16x32xf32>
      %63 = arith.subf %57, %62 : vector<16x32xf32>
      %64 = arith.mulf %63, %63 : vector<16x32xf32>
      %cst_40 = arith.constant dense<0.000000e+00> : vector<16xf32>
      %65 = vector.multi_reduction <add>, %64, %cst_40 [1] : vector<16x32xf32> to vector<16xf32>
      %66 = vector.shape_cast %65 : vector<16xf32> to vector<16x1xf32>
      %cst_41 = arith.constant 3.200000e+01 : f32
      %67 = vector.broadcast %cst_41 : f32 to vector<16x1xf32>
      %68 = arith.divf %66, %67 : vector<16x1xf32>
      %69 = vector.broadcast %61 : vector<16x1xf32> to vector<16x32xf32>
      %70 = arith.subf %57, %69 : vector<16x32xf32>
      %cst_42 = arith.constant 9.99999996E-13 : f32
      %71 = vector.broadcast %cst_42 : f32 to vector<16x1xf32>
      %72 = arith.addf %68, %71 : vector<16x1xf32>
      %73 = math.rsqrt %72 : vector<16x1xf32>
      %74 = vector.broadcast %73 : vector<16x1xf32> to vector<16x32xf32>
      %75 = arith.mulf %70, %74 : vector<16x32xf32>
      %c0_43 = arith.constant 0 : index
      %c0_44 = arith.constant 0 : index
      %76 = vector.load %arg6[%c0_43, %c0_44] : memref<1x32xf32, #tpu.memory_space<vmem>>, vector<1x32xf32>
      %77 = vector.broadcast %76 : vector<1x32xf32> to vector<16x32xf32>
      %78 = arith.mulf %75, %77 : vector<16x32xf32>
      %c0_45 = arith.constant 0 : index
      %c0_46 = arith.constant 0 : index
      %79 = vector.load %arg7[%c0_45, %c0_46] : memref<1x32xf32, #tpu.memory_space<vmem>>, vector<1x32xf32>
      %80 = vector.broadcast %79 : vector<1x32xf32> to vector<16x32xf32>
      %81 = arith.addf %78, %80 : vector<16x32xf32>
      %82 = arith.truncf %81 : vector<16x32xf32> to vector<16x32xbf16>
      %c0_47 = arith.constant 0 : index
      %c0_48 = arith.constant 0 : index
      %83 = vector.load %arg12[%c0_47, %c0_48] : memref<16x32xbf16, #tpu.memory_space<vmem>>, vector<16x32xbf16>
      tpu.vector_store %arg12[%c0_47, %c0_48], %82 {strides = array<i32>} : memref<16x32xbf16, #tpu.memory_space<vmem>>, vector<16x32xbf16>,
      %cst_49 = arith.constant 0xFF800000 : f32
      %84 = vector.broadcast %cst_49 : f32 to vector<16x1xf32>
      %c0_50 = arith.constant 0 : index
      %c0_51 = arith.constant 0 : index
      %85 = vector.load %arg13[%c0_50, %c0_51] : memref<16x1xf32, #tpu.memory_space<vmem>>, vector<16x1xf32>
      tpu.vector_store %arg13[%c0_50, %c0_51], %84 {strides = array<i32>} : memref<16x1xf32, #tpu.memory_space<vmem>>, vector<16x1xf32>,
      %cst_52 = arith.constant 0.000000e+00 : f32
      %86 = vector.broadcast %cst_52 : f32 to vector<16x1xf32>
      %c0_53 = arith.constant 0 : index
      %c0_54 = arith.constant 0 : index
      %87 = vector.load %arg14[%c0_53, %c0_54] : memref<16x1xf32, #tpu.memory_space<vmem>>, vector<16x1xf32>
      tpu.vector_store %arg14[%c0_53, %c0_54], %86 {strides = array<i32>} : memref<16x1xf32, #tpu.memory_space<vmem>>, vector<16x1xf32>,
      %cst_55 = arith.constant 0.000000e+00 : f32
      %88 = vector.broadcast %cst_55 : f32 to vector<16x1xf32>
      %c0_56 = arith.constant 0 : index
      %c0_57 = arith.constant 0 : index
      %89 = vector.load %arg15[%c0_56, %c0_57] : memref<16x1xf32, #tpu.memory_space<vmem>>, vector<16x1xf32>
      tpu.vector_store %arg15[%c0_56, %c0_57], %88 {strides = array<i32>} : memref<16x1xf32, #tpu.memory_space<vmem>>, vector<16x1xf32>,
    } else {
    }
    %c0 = arith.constant 0 : index
    %c0_1 = arith.constant 0 : index
    %3 = vector.load %arg12[%c0, %c0_1] : memref<16x32xbf16, #tpu.memory_space<vmem>>, vector<16x32xbf16>
    %c0_2 = arith.constant 0 : index
    %c0_3 = arith.constant 0 : index
    %4 = vector.load %arg8[%c0_2, %c0_3] : memref<32x64xbf16, #tpu.memory_space<vmem>>, vector<32x64xbf16>
    %cst = arith.constant dense<0.000000e+00> : vector<16x64xf32>
    %5 = tpu.matmul %3, %4, %cst {dimension_numbers = #tpu.dot_dimension_numbers<[1], [0], [0], [1], [0, 0, 1, 1], [], []>} : vector<16x32xbf16>, vector<32x64xbf16>, vector<16x64xf32> -> vector<16x64xf32>
    %c0_4 = arith.constant 0 : index
    %c0_5 = arith.constant 0 : index
    %6 = vector.load %arg9[%c0_4, %c0_5] : memref<1x64xf32, #tpu.memory_space<vmem>>, vector<1x64xf32>
    %7 = vector.broadcast %6 : vector<1x64xf32> to vector<16x64xf32>
    %8 = arith.addf %5, %7 : vector<16x64xf32>
    %c0_6 = arith.constant 0 : index
    %c0_7 = arith.constant 0 : index
    %9 = vector.load %arg10[%c0_6, %c0_7] : memref<16x64xf32, #tpu.memory_space<vmem>>, vector<16x64xf32>
    tpu.vector_store %arg10[%c0_6, %c0_7], %8 {strides = array<i32>} : memref<16x64xf32, #tpu.memory_space<vmem>>, vector<16x64xf32>,
    %c0_8 = arith.constant 0 : index
    %c0_9 = arith.constant 0 : index
    %10 = vector.load %arg13[%c0_8, %c0_9] : memref<16x1xf32, #tpu.memory_space<vmem>>, vector<16x1xf32>
    %cst_10 = arith.constant dense<0xFF800000> : vector<16xf32>
    %11 = vector.multi_reduction <maximumf>, %8, %cst_10 [1] : vector<16x64xf32> to vector<16xf32>
    %12 = vector.shape_cast %11 : vector<16xf32> to vector<16x1xf32>
    %13 = arith.maximumf %10, %12 : vector<16x1xf32>
    %c0_11 = arith.constant 0 : index
    %c0_12 = arith.constant 0 : index
    %14 = vector.load %arg14[%c0_11, %c0_12] : memref<16x1xf32, #tpu.memory_space<vmem>>, vector<16x1xf32>
    %15 = arith.subf %10, %13 : vector<16x1xf32>
    %16 = math.exp %15 : vector<16x1xf32>
    %17 = arith.mulf %14, %16 : vector<16x1xf32>
    %18 = vector.broadcast %13 : vector<16x1xf32> to vector<16x64xf32>
    %19 = arith.subf %8, %18 : vector<16x64xf32>
    %20 = math.exp %19 : vector<16x64xf32>
    %cst_13 = arith.constant dense<0.000000e+00> : vector<16xf32>
    %21 = vector.multi_reduction <add>, %20, %cst_13 [1] : vector<16x64xf32> to vector<16xf32>
    %22 = vector.shape_cast %21 : vector<16xf32> to vector<16x1xf32>
    %23 = arith.addf %17, %22 : vector<16x1xf32>
    %c0_14 = arith.constant 0 : index
    %c0_15 = arith.constant 0 : index
    %24 = vector.load %arg14[%c0_14, %c0_15] : memref<16x1xf32, #tpu.memory_space<vmem>>, vector<16x1xf32>
    tpu.vector_store %arg14[%c0_14, %c0_15], %23 {strides = array<i32>} : memref<16x1xf32, #tpu.memory_space<vmem>>, vector<16x1xf32>,
    %c0_16 = arith.constant 0 : index
    %c0_17 = arith.constant 0 : index
    %25 = vector.load %arg13[%c0_16, %c0_17] : memref<16x1xf32, #tpu.memory_space<vmem>>, vector<16x1xf32>
    tpu.vector_store %arg13[%c0_16, %c0_17], %13 {strides = array<i32>} : memref<16x1xf32, #tpu.memory_space<vmem>>, vector<16x1xf32>,
    %c0_18 = arith.constant 0 : index
    %c0_19 = arith.constant 0 : index
    %26 = vector.load %arg3[%c0_18, %c0_19] : memref<16x1xi32, #tpu.memory_space<vmem>>, vector<16x1xi32>
    %27 = tpu.iota {dimensions = array<i32: 1>} : vector<16x64xi32>
    %c64_i32 = arith.constant 64 : i32
    %28 = arith.muli %arg1, %c64_i32 : i32
    %29 = vector.broadcast %28 : i32 to vector<16x64xi32>
    %30 = arith.addi %27, %29 : vector<16x64xi32>
    %c0_20 = arith.constant 0 : index
    %c0_21 = arith.constant 0 : index
    %31 = vector.load %arg15[%c0_20, %c0_21] : memref<16x1xf32, #tpu.memory_space<vmem>>, vector<16x1xf32>
    %32 = vector.broadcast %26 : vector<16x1xi32> to vector<16x64xi32>
    %33 = arith.cmpi eq, %30, %32 : vector<16x64xi32>
    %cst_22 = arith.constant 0.000000e+00 : f32
    %34 = vector.broadcast %cst_22 : f32 to vector<16x64xf32>
    %35 = arith.select %33, %8, %34 : vector<16x64xi1>, vector<16x64xf32>
    %cst_23 = arith.constant dense<0.000000e+00> : vector<16xf32>
    %36 = vector.multi_reduction <add>, %35, %cst_23 [1] : vector<16x64xf32> to vector<16xf32>
    %37 = vector.shape_cast %36 : vector<16xf32> to vector<16x1xf32>
    %38 = arith.addf %31, %37 : vector<16x1xf32>
    %c0_24 = arith.constant 0 : index
    %c0_25 = arith.constant 0 : index
    %39 = vector.load %arg15[%c0_24, %c0_25] : memref<16x1xf32, #tpu.memory_space<vmem>>, vector<16x1xf32>
    tpu.vector_store %arg15[%c0_24, %c0_25], %38 {strides = array<i32>} : memref<16x1xf32, #tpu.memory_space<vmem>>, vector<16x1xf32>,
    %c0_i32_26 = arith.constant 0 : i32
    %40 = arith.cmpi eq, %arg1, %c0_i32_26 : i32
    %41 = arith.extui %40 : i1 to i32
    %c0_i32_27 = arith.constant 0 : i32
    %42 = arith.cmpi ne, %41, %c0_i32_27 : i32
    scf.if %42 {
      %c0_28 = arith.constant 0 : index
      %c0_29 = arith.constant 0 : index
      %43 = vector.load %arg13[%c0_28, %c0_29] : memref<16x1xf32, #tpu.memory_space<vmem>>, vector<16x1xf32>
      %c0_30 = arith.constant 0 : index
      %c0_31 = arith.constant 0 : index
      %44 = vector.load %arg14[%c0_30, %c0_31] : memref<16x1xf32, #tpu.memory_space<vmem>>, vector<16x1xf32>
      %45 = math.log %44 : vector<16x1xf32>
      %46 = arith.addf %43, %45 : vector<16x1xf32>
      %c0_32 = arith.constant 0 : index
      %c0_33 = arith.constant 0 : index
      %47 = vector.load %arg3[%c0_32, %c0_33] : memref<16x1xi32, #tpu.memory_space<vmem>>, vector<16x1xi32>
      %c-100_i32 = arith.constant -100 : i32
      %48 = vector.broadcast %c-100_i32 : i32 to vector<16x1xi32>
      %49 = arith.cmpi ne, %47, %48 : vector<16x1xi32>
      %c0_34 = arith.constant 0 : index
      %c0_35 = arith.constant 0 : index
      %50 = vector.load %arg15[%c0_34, %c0_35] : memref<16x1xf32, #tpu.memory_space<vmem>>, vector<16x1xf32>
      %51 = arith.subf %46, %50 : vector<16x1xf32>
      %cst_36 = arith.constant 0.000000e+00 : f32
      %52 = vector.broadcast %cst_36 : f32 to vector<16x1xf32>
      %53 = arith.select %49, %51, %52 : vector<16x1xi1>, vector<16x1xf32>
      %c0_37 = arith.constant 0 : index
      %c0_38 = arith.constant 0 : index
      %54 = vector.load %arg11[%c0_37, %c0_38] : memref<16x1xf32, #tpu.memory_space<vmem>>, vector<16x1xf32>
      tpu.vector_store %arg11[%c0_37, %c0_38], %53 {strides = array<i32>} : memref<16x1xf32, #tpu.memory_space<vmem>>, vector<16x1xf32>,
    } else {
    }
    return
  }
  func.func @transform_0(%arg0: i32, %arg1: i32) -> (i32, i32) {
    %c0_i32 = arith.constant 0 : i32
    %c0_i32_0 = arith.constant 0 : i32
    return %arg0, %c0_i32 : i32, i32
  }
  func.func @transform_1(%arg0: i32, %arg1: i32) -> (i32, i32) {
    %c0_i32 = arith.constant 0 : i32
    %c0_i32_0 = arith.constant 0 : i32
    return %arg0, %c0_i32 : i32, i32
  }
  func.func @transform_2(%arg0: i32, %arg1: i32) -> (i32, i32) {
    %c0_i32 = arith.constant 0 : i32
    %c0_i32_0 = arith.constant 0 : i32
    %c0_i32_1 = arith.constant 0 : i32
    return %c0_i32, %c0_i32_0 : i32, i32
  }
  func.func @transform_3(%arg0: i32, %arg1: i32) -> (i32, i32) {
    %c0_i32 = arith.constant 0 : i32
    %c0_i32_0 = arith.constant 0 : i32
    %c0_i32_1 = arith.constant 0 : i32
    return %c0_i32, %c0_i32_0 : i32, i32
  }
  func.func @transform_4(%arg0: i32, %arg1: i32) -> (i32, i32) {
    %c0_i32 = arith.constant 0 : i32
    %c0_i32_0 = arith.constant 0 : i32
    %c0_i32_1 = arith.constant 0 : i32
    return %c0_i32, %c0_i32_0 : i32, i32
  }
  func.func @transform_5(%arg0: i32, %arg1: i32) -> (i32, i32) {
    %c0_i32 = arith.constant 0 : i32
    %c0_i32_0 = arith.constant 0 : i32
    %c0_i32_1 = arith.constant 0 : i32
    return %c0_i32, %c0_i32_0 : i32, i32
  }
  func.func @transform_6(%arg0: i32, %arg1: i32) -> (i32, i32) {
    %c0_i32 = arith.constant 0 : i32
    %c0_i32_0 = arith.constant 0 : i32
    return %c0_i32, %arg1 : i32, i32
  }
  func.func @transform_7(%arg0: i32, %arg1: i32) -> (i32, i32) {
    %c0_i32 = arith.constant 0 : i32
    %c0_i32_0 = arith.constant 0 : i32
    return %c0_i32, %arg1 : i32, i32
  }
  func.func @transform_8(%arg0: i32, %arg1: i32) -> (i32, i32) {
    %c0_i32 = arith.constant 0 : i32
    return %arg0, %arg1 : i32, i32
  }
  func.func @transform_9(%arg0: i32, %arg1: i32) -> (i32, i32) {
    %c0_i32 = arith.constant 0 : i32
    %c0_i32_0 = arith.constant 0 : i32
    return %arg0, %c0_i32 : i32, i32
  }
}

</mosaic_0001>

<bundles_post_ra>
// kernel: tpu_custom_call.1
= control target key start
LH: loop header
LB: loop body
LE: loop exit
PB: predicated region body
PF: predicated region fallthrough
CT: control target
= control target key end

     0   :  { %15 = vsyncpa [#allocation7], 0  ;;  %s744_s0 = inlined_call_operand.vmem [shape: f32[16,32], index: 0, kind: input, shape index: {}]   ;;  %s745_s1 = inlined_call_operand.vmem [shape: s32[16,1], index: 1, kind: input, shape index: {}]   ;;  %s746_s2 = inlined_call_operand.hbm [shape: bf16[32,32], index: 2, kind: input, shape index: {}]   ;;  %s747_s3 = inlined_call_operand.vmem [shape: f32[1,32], index: 3, kind: input, shape index: {}]   ;;  %s748_s4 = inlined_call_operand.vmem [shape: f32[1,32], index: 4, kind: input, shape index: {}]   ;;  %s749_s5 = inlined_call_operand.vmem [shape: f32[1,32], index: 5, kind: input, shape index: {}]   ;;  %s750_s6 = inlined_call_operand.hbm [shape: bf16[32,64], index: 6, kind: input, shape index: {}]   ;;  %s751_s7 = inlined_call_operand.vmem [shape: f32[1,64], index: 7, kind: input, shape index: {}]   ;;  %s752_s8 = inlined_call_operand.hbm [shape: f32[16,64], index: 8, kind: output, shape index: {0}]   ;;  %s753_s9 = inlined_call_operand.vmem [shape: f32[16,1], index: 9, kind: output, shape index: {1}]  }
   0x1   :  { %16 = vsyncpa [#allocation10], 0 }
   0x2   :  { %17 = vsyncpa [#allocation8], 0  ;;  %s26_s11 = sshll.u32 %s746_s2, 4  ;;  %s595_s12 = smov [#allocation6]   ;;  %s27_s11 = int_to_ptr.hbm [resolvable:$true] %s26_s11 }
   0x3   :  { %s28_s13 = sshll.u32 %s595_s12, 4  ;;  %s45_s16 = sshll.u32 %s750_s6, 4  ;;  %s29_s13 = int_to_ptr.vmem [resolvable:$true] %s28_s13  ;;  %s46_s16 = int_to_ptr.hbm [resolvable:$true] %s45_s16 }
   0x4   :  { %s596_s17 = smov 64   ;;  %s597_s18 = smov 4  }
   0x5   :  { %34 = dma.hbm_to_vmem [thread:$0]  %s27_s11, 256, %s29_s13, [#allocation7], %s596_s17, %s596_s17, %s597_s18  }
   0x6   :  { %s598_s19 = smov [#allocation9]  }
   0x7   :  { %s47_s20 = sshll.u32 %s598_s19, 4  ;;  %s48_s20 = int_to_ptr.vmem [resolvable:$true] %s47_s20 }
   0x8   :  { %53 = dma.hbm_to_vmem [thread:$0]  %s46_s16, 256, %s48_s20, [#allocation10], %s596_s17, %s596_s17, %s597_s18  }
   0x9   :  { %589 = dma.done.wait [#allocation7], 256  }
   0xa   :  { %590 = vsyncadd [#allocation7], 4294967040 }
   0xb   :  { %591 = dma.done.wait [#allocation10], 256  }
   0xc   :  { %592 = vsyncadd [#allocation10], 4294967040  ;;  %v473_v0 = vld [vmem:[#allocation6 + $0x8] sm:$0xff]  ;;  %v472_v1 = vld [vmem:[#allocation6] sm:$0xff]  ;;  %vm92_vm0 = vcmask 261120   ;;  %vm263_vm14 = vcmask 257024  }
   0xd   :  { %v69_v2 = vld [vmem:[%s744_s0] sm:$0xff]  ;;  %v70_v3 = vld [vmem:[%s744_s0 + $0x8] sm:$0xff]  ;;  %102 = vmatpush.bf16.msra.mxu0 %v473_v0  ;;  %s430_s12 = sshll.u32 %s752_s8, 4  ;;  %s604_s13 = smov 128   ;;  %s431_s12 = int_to_ptr.hbm [resolvable:$true] %s430_s12 }
   0xe   :  { %v71_v4 = vpack.c.bf16 %v70_v3, %v69_v2  ;;  %v491_v5 = vld [vmem:[%s747_s3] ss:$0 sm:$0xff]  ;;  %s605_s14 = smov 8  }
  0x11   :  { %103 = vmatpush.bf16.msra.mxu0 %v472_v1 }
  0x14   :  { %456 = vmatmul.msk.bf16.vlgmr.msra.gmra.mxu0 %vm92_vm0, %v71_v4 }
  0x91   :  { %v105_v6 = vpop.f32.mrf.mxu0 }
  0x92   :  { %v672_v7 = vadd.f32 %v491_v5, %v105_v6 }
  0x94   :  { %v112_v8 = vmul.f32 0.70710677, %v672_v7 }
  0x96   :  { %v114_v9 = vmul.f32 %v112_v8, %v112_v8 }
  0x98   :  { %v115_v10 = vmin.f32 %v114_v9, 16.0 }
  0x99   :  { %v107_v11 = vpop.f32.mrf.mxu0 }
  0x9a   :  { %v116_v12 = vmul.f32 2.1237322e-06, %v115_v10  ;;  %v675_v13 = vadd.f32 %v491_v5, %v107_v11  ;;  %v127_v14 = vmul.f32 3.8918573e-05, %v115_v10 }
  0x9c   :  { %v117_v15 = vadd.f32 0.00028619796, %v116_v12  ;;  %v678_v16 = vmul.f32 0.70710677, %v675_v13  ;;  %v128_v17 = vadd.f32 0.001143296, %v127_v14 }
  0x9e   :  { %v118_v18 = vmul.f32 %v117_v15, %v115_v10  ;;  %v154_v19 = vmul.f32 %v678_v16, %v678_v16  ;;  %v129_v20 = vmul.f32 %v128_v17, %v115_v10  ;;  %v110_v15 = vmul.f32 0.5, %v672_v7 }
  0xa0   :  { %v155_v21 = vmin.f32 %v154_v19, 16.0  ;;  %v130_v22 = vadd.f32 0.014752088, %v129_v20  ;;  %v119_v23 = vadd.f32 0.0036580483, %v118_v18 }
  0xa2   :  { %v156_v24 = vmul.f32 2.1237322e-06, %v155_v21  ;;  %v167_v25 = vmul.f32 3.8918573e-05, %v155_v21  ;;  %v131_v26 = vmul.f32 %v130_v22, %v115_v10  ;;  %v120_v30 = vmul.f32 %v119_v23, %v115_v10 }
  0xa4   :  { %v157_v27 = vadd.f32 0.00028619796, %v156_v24  ;;  %v168_v28 = vadd.f32 0.001143296, %v167_v25  ;;  %v132_v29 = vadd.f32 0.112945676, %v131_v26 }
  0xa5   :  { %v121_v37 = vadd.f32 0.05243302, %v120_v30  ;;  %v111_v25 = vmul.f32 0.5, %v675_v13 }
  0xa6   :  { %v158_v31 = vmul.f32 %v157_v27, %v155_v21  ;;  %v169_v32 = vmul.f32 %v168_v28, %v155_v21  ;;  %v133_v33 = vmul.f32 %v132_v29, %v115_v10  ;;  %v599_v28 = vmov 32.0  }
  0xa7   :  { %v122_v43 = vmul.f32 %v121_v37, %v115_v10 }
  0xa8   :  { %v170_v34 = vadd.f32 0.014752088, %v169_v32  ;;  %v159_v35 = vadd.f32 0.0036580483, %v158_v31  ;;  %v134_v36 = vadd.f32 0.4994258, %v133_v33 }
  0xa9   :  { %v123_v47 = vadd.f32 0.18741608, %v122_v43 }
  0xaa   :  { %v171_v38 = vmul.f32 %v170_v34, %v155_v21  ;;  %v135_v39 = vmul.f32 %v134_v36, %v115_v10  ;;  %v160_v41 = vmul.f32 %v159_v35, %v155_v21 }
  0xab   :  { %v124_v52 = vmul.f32 %v123_v47, %v115_v10 }
  0xac   :  { %v172_v40 = vadd.f32 0.112945676, %v171_v38  ;;  %v136_v42 = vadd.f32 1.0, %v135_v39  ;;  %v161_v46 = vadd.f32 0.05243302, %v160_v41 }
  0xad   :  { %v125_v57 = vadd.f32 1.1283791, %v124_v52 }
  0xae   :  { %v173_v44 = vmul.f32 %v172_v40, %v155_v21  ;;  %495 = vrcp.f32 %v136_v42  ;;  %v162_v51 = vmul.f32 %v161_v46, %v155_v21  ;;  %v148_v56 = vand.u32 2147483648, %v136_v42  ;;  %v476_v46 = vld [vmem:[#allocation9 + $0x8] sm:$0xff] }
  0xaf   :  { %v146_v59 = vand.u32 2147483647, %v136_v42  ;;  %vm142_vm2 = vweird.f32 %v136_v42  ;;  %v126_v1 = vmul.f32 %v125_v57, %v112_v8  ;;  %310 = vmatpush.bf16.msra.mxu1 %v476_v46 }
  0xb0   :  { %v174_v45 = vadd.f32 0.4994258, %v173_v44  ;;  %v163_v55 = vadd.f32 0.18741608, %v162_v51  ;;  %v149_v63 = vor.u32 1.1754944e-38, %v148_v56 }
  0xb1   :  { %vm147_vm4 = vcmp.eq.f32.partialorder %v146_v59, 8.507059e+37  ;;  %v492_v59 = vld [vmem:[%s748_s4] ss:$0 sm:$0xff] }
  0xb2   :  { %v175_v48 = vmul.f32 %v174_v45, %v155_v21  ;;  %v164_v62 = vmul.f32 %v163_v55, %v155_v21 }
  0xb4   :  { %v176_v49 = vadd.f32 1.0, %v175_v48  ;;  %v496_v50 = vpop.eup %495  ;;  %v165_v9 = vadd.f32 1.1283791, %v164_v62  ;;  %v493_v62 = vld [vmem:[%s749_s5] ss:$0 sm:$0xff] }
  0xb5   :  { %v138_v53 = vmul.f32 %v496_v50, %v136_v42  ;;  %vm143_vm1 = vweird.f32 %v496_v50 }
  0xb6   :  { %497 = vrcp.f32 %v176_v49  ;;  %vm144_vm3 = vmor %vm142_vm2, %vm143_vm1  ;;  %v188_v6 = vand.u32 2147483648, %v176_v49  ;;  %v186_v11 = vand.u32 2147483647, %v176_v49  ;;  %vm182_vm6 = vweird.f32 %v176_v49 }
  0xb7   :  { %v139_v54 = vsub.f32 1.0, %v138_v53  ;;  %v166_v8 = vmul.f32 %v165_v9, %v678_v16  ;;  %499 = vrcp.f32 %v599_v28  ;;  %vm318_vm2 = vcmask 523264  }
  0xb8   :  { %v189_v18 = vor.u32 1.1754944e-38, %v188_v6  ;;  %vm187_vm8 = vcmp.eq.f32.partialorder %v186_v11, 8.507059e+37 }
  0xb9   :  { %v140_v58 = vmul.f32 %v496_v50, %v139_v54 }
  0xbb   :  { %v141_v61 = vadd.f32 %v496_v50, %v140_v58 }
  0xbc   :  { %v498_v60 = vpop.eup %497 }
  0xbd   :  { %v178_v0 = vmul.f32 %v498_v60, %v176_v49  ;;  %v145_v2 = vsel %vm144_vm3, %v496_v50, %v141_v61  ;;  %vm183_vm5 = vweird.f32 %v498_v60  ;;  %v500_v29 = vpop.eup %499  ;;  %v475_v49 = vld [vmem:[#allocation9] sm:$0xff] }
  0xbe   :  { %v150_v3 = vsel %vm147_vm4, %v149_v63, %v145_v2  ;;  %vm184_vm7 = vmor %vm182_vm6, %vm183_vm5  ;;  %v205_v16 = vmul.f32 32.0, %v500_v29  ;;  %vm209_vm9 = vweird.f32 %v500_v29  ;;  %311 = vmatpush.bf16.msra.mxu1 %v475_v49 }
  0xbf   :  { %v179_v4 = vsub.f32 1.0, %v178_v0  ;;  %v151_v5 = vmul.f32 %v150_v3, %v126_v1 }
  0xc0   :  { %v206_v30 = vsub.f32 1.0, %v205_v16 }
  0xc1   :  { %v180_v10 = vmul.f32 %v498_v60, %v179_v4  ;;  %v457_v12 = vclamps-f32 %v151_v5, 1.0 }
  0xc2   :  { %v207_v31 = vmul.f32 %v500_v29, %v206_v30 }
  0xc3   :  { %v181_v14 = vadd.f32 %v498_v60, %v180_v10  ;;  %v194_v17 = vadd.f32 1.0, %v457_v12 }
  0xc4   :  { %v208_v32 = vadd.f32 %v500_v29, %v207_v31 }
  0xc5   :  { %v185_v19 = vsel %vm184_vm7, %v498_v60, %v181_v14  ;;  %v196_v20 = vmul.f32 %v194_v17, %v110_v15  ;;  %v600_v15 = vmov 0   ;;  %v494_v17 = vld [vmem:[%s751_s7] ss:$0 sm:$0xff] }
  0xc6   :  { %v190_v21 = vsel %vm187_vm8, %v189_v18, %v185_v19  ;;  %v210_v33 = vsel %vm209_vm9, %v500_v29, %v208_v32  ;;  %490 = vset.pattern.permute.xlu2 %v600_v15  ;;  %488 = vset.pattern.permute.xlu0 %v600_v15 }
  0xc7   :  { %v191_v22 = vmul.f32 %v190_v21, %v166_v8  ;;  %v198_v23 = vsel %vm92_vm0, %v196_v20, 0.0  ;;  %489 = vset.pattern.permute.xlu1 %v600_v15 }
  0xc8   :  { %199 = vadd.xlane.f32.xlu0 %v198_v23  ;;  %v601_v23 = vmov -inf  }
  0xc9   :  { %v458_v24 = vclamps-f32 %v191_v22, 1.0 }
  0xcb   :  { %v195_v26 = vadd.f32 1.0, %v458_v24  ;;  %v708_v24 = vld [vmem:[%s745_s1] sm:$0xff] }
  0xcc   :  { %vm414_vm5 = vcmp.ne.s32.totalorder %v708_v24, 4294967196 }
  0xcd   :  { %v197_v27 = vmul.f32 %v195_v26, %v111_v25  ;;  %v714_v25 = vld [vmem:[%s745_s1 + $0x8] sm:$0xff]  ;;  %v602_v26 = vmov 0.0   ;;  %s603_s1 = smov [#allocation11]  }
  0xce   :  { %s428_s30 = sshll.u32 %s603_s1, 4  ;;  %vm415_vm6 = vcmp.ne.s32.totalorder %v714_v25, 4294967196  ;;  %s429_s30 = int_to_ptr.vmem [resolvable:$true] %s428_s30 }
  0xcf   :  { %v201_v7 = vsel %vm92_vm0, %v197_v27, 0.0 }
  0xd0   :  { %202 = vadd.xlane.f32.xlu0 %v201_v7 }
 0x13b   :  { %v200_v34 = vpop.xlane.xlu0 %199 }
 0x13c   :  { %v211_v35 = vmul.f32 %v210_v33, %v200_v34 }
 0x13e   :  { %v213_v36 = vsub.f32 %v196_v20, %v211_v35 }
 0x140   :  { %v215_v37 = vmul.f32 %v213_v36, %v213_v36 }
 0x142   :  { %v217_v13 = vsel %vm92_vm0, %v215_v37, 0.0 }
 0x143   :  { %218 = vadd.xlane.f32.xlu1 %v217_v13  ;;  %v203_v38 = vpop.xlane.xlu0 %202 }
 0x144   :  { %v212_v39 = vmul.f32 %v210_v33, %v203_v38 }
 0x146   :  { %v214_v40 = vsub.f32 %v197_v27, %v212_v39 }
 0x148   :  { %v216_v41 = vmul.f32 %v214_v40, %v214_v40 }
 0x14a   :  { %v220_v42 = vsel %vm92_vm0, %v216_v41, 0.0 }
 0x14b   :  { %221 = vadd.xlane.f32.xlu1 %v220_v42 }
 0x1b6   :  { %v219_v43 = vpop.xlane.xlu1 %218 }
 0x1b7   :  { %v223_v44 = vmul.f32 %v219_v43, %v210_v33 }
 0x1b9   :  { %v225_v45 = vadd.f32 1e-12, %v223_v44 }
 0x1bb   :  { %501 = vrsqrt.f32 %v225_v45  ;;  %vm233_vm11 = vweird.f32 %v225_v45 }
 0x1be   :  { %v222_v47 = vpop.xlane.xlu1 %221 }
 0x1bf   :  { %v224_v48 = vmul.f32 %v222_v47, %v210_v33  ;;  %v372_v33 = vlaneseq }
 0x1c1   :  { %v502_v50 = vpop.eup %501  ;;  %v226_v51 = vadd.f32 1e-12, %v224_v48  ;;  %v373_v34 = vand.u32 127, %v372_v33 }
 0x1c2   :  { %v228_v52 = vmul.f32 %v502_v50, %v225_v45  ;;  %vm234_vm10 = vweird.f32 %v502_v50 }
 0x1c3   :  { %503 = vrsqrt.f32 %v226_v51  ;;  %vm235_vm12 = vmor %vm233_vm11, %vm234_vm10  ;;  %vm243_vm15 = vweird.f32 %v226_v51 }
 0x1c4   :  { %v229_v53 = vmul.f32 %v502_v50, %v228_v52 }
 0x1c6   :  { %v230_v54 = vmul.f32 0.5, %v229_v53 }
 0x1c8   :  { %v231_v55 = vsub.f32 1.5, %v230_v54 }
 0x1c9   :  { %v504_v56 = vpop.eup %503 }
 0x1ca   :  { %v232_v57 = vmul.f32 %v502_v50, %v231_v55  ;;  %v238_v58 = vmul.f32 %v504_v56, %v226_v51  ;;  %vm244_vm13 = vweird.f32 %v504_v56 }
 0x1cb   :  { %vm245_vm1 = vmor %vm243_vm15, %vm244_vm13 }
 0x1cc   :  { %v236_v60 = vsel %vm235_vm12, %v502_v50, %v232_v57  ;;  %v239_v61 = vmul.f32 %v504_v56, %v238_v58 }
 0x1cd   :  { %v247_v63 = vmul.f32 %v236_v60, %v213_v36 }
 0x1ce   :  { %v240_v0 = vmul.f32 0.5, %v239_v61 }
 0x1cf   :  { %v253_v1 = vmul.f32 %v492_v59, %v247_v63 }
 0x1d0   :  { %v241_v2 = vsub.f32 1.5, %v240_v0 }
 0x1d1   :  { %v259_v3 = vadd.f32 %v493_v62, %v253_v1 }
 0x1d2   :  { %v242_v4 = vmul.f32 %v504_v56, %v241_v2 }
 0x1d3   :  { %v261_v5 = vpack.c.bf16 %v259_v3, %v259_v3 }
 0x1d4   :  { %v246_v6 = vsel %vm245_vm1, %v504_v56, %v242_v4 }
 0x1d5   :  { %264 = vst.msk [vmem:[#allocation2] sm:$0xf] %vm263_vm14, %v261_v5  ;;  %v248_v9 = vmul.f32 %v246_v6, %v214_v40 }
 0x1d7   :  { %v254_v10 = vmul.f32 %v492_v59, %v248_v9 }
 0x1d9   :  { %v260_v11 = vadd.f32 %v493_v62, %v254_v10 }
 0x1db   :  { %v262_v12 = vpack.c.bf16 %v260_v11, %v260_v11 }
 0x1dd   :  { %265 = vst.msk [vmem:[#allocation2 + $0x4] sm:$0xf] %vm263_vm14, %v262_v12 }
 0x1e4   :  { %v474_v14 = vld [vmem:[#allocation2] sm:$0xff] }
 0x1e5   :  { %471 = vmatmul.msk.bf16.vlgmr.msra.gmra.mxu1 %vm92_vm0, %v474_v14  ;;  %vm266_vm0 = vcmask 7168  }
 0x1e6   :  { %267 = vst.msk [vmem:[#allocation3] sm:$0xff] %vm266_vm0, %v601_v23 }
 0x1e7   :  { %268 = vst.msk [vmem:[#allocation3 + $0x8] sm:$0xff] %vm266_vm0, %v601_v23 }
 0x1e8   :  { %271 = vst.msk [vmem:[#allocation5] sm:$0xff] %vm266_vm0, %v602_v26 }
 0x1e9   :  { %269 = vst.msk [vmem:[#allocation4] sm:$0xff] %vm266_vm0, %v602_v26 }
 0x1ea   :  { %270 = vst.msk [vmem:[#allocation4 + $0x8] sm:$0xff] %vm266_vm0, %v602_v26 }
 0x1eb   :  { %272 = vst.msk [vmem:[#allocation5 + $0x8] sm:$0xff] %vm266_vm0, %v602_v26 }
 0x1ed   :  { %v321_v27 = vld [vmem:[#allocation3] sm:$0xff] }
 0x1ee   :  { %v322_v16 = vld [vmem:[#allocation3 + $0x8] sm:$0xff] }
 0x1ef   :  { %v377_v50 = vld [vmem:[#allocation5] sm:$0xff] }
 0x1f0   :  { %v331_v56 = vld [vmem:[#allocation4] sm:$0xff] }
 0x1f1   :  { %v332_v61 = vld [vmem:[#allocation4 + $0x8] sm:$0xff] }
 0x1f2   :  { %v378_v62 = vld [vmem:[#allocation5 + $0x8] sm:$0xff] }
 0x262   :  { %v313_v18 = vpop.f32.mrf.mxu1 }
 0x263   :  { %v314_v8 = vadd.f32 %v494_v17, %v313_v18 }
 0x265   :  { %319 = vst.msk [vmem:[#allocation11] sm:$0xff] %vm318_vm2, %v314_v8  ;;  %v323_v19 = vsel %vm318_vm2, %v314_v8, -inf }
 0x266   :  { %324 = vmax.xlane.f32.xlu2 %v323_v19 }
 0x26a   :  { %v315_v20 = vpop.f32.mrf.mxu1 }
 0x26b   :  { %v316_v21 = vadd.f32 %v494_v17, %v315_v20 }
 0x26d   :  { %320 = vst.msk [vmem:[#allocation11 + $0x8] sm:$0xff] %vm318_vm2, %v316_v21  ;;  %v326_v22 = vsel %vm318_vm2, %v316_v21, -inf }
 0x26e   :  { %327 = vmax.xlane.f32.xlu2 %v326_v22  ;;  %436 = dma.vmem_to_hbm [thread:$0]  %s429_s30, 256, %s431_s12, [#allocation8], %s604_s13, %s604_s13, %s605_s14  }
 0x286   :  { %380 = vperm.xlu2 %490, %v708_v24  }
 0x28e   :  { %383 = vperm.xlu2 %490, %v714_v25  }
 0x2d9   :  { %v325_v7 = vpop.xlane.xlu2 %324 }
 0x2da   :  { %v329_v28 = vmax.f32 %v321_v27, %v325_v7 }
 0x2dc   :  { %v333_v29 = vsub.f32 %v321_v27, %v329_v28  ;;  %368 = vst.msk [vmem:[#allocation3] sm:$0xff] %vm266_vm0, %v329_v28  ;;  %343 = vperm.xlu0 %488, %v329_v28  }
 0x2de   :  { %v335_v53 = vmul.f32 1.442695, %v333_v29 }
 0x2e1   :  { %v328_v30 = vpop.xlane.xlu2 %327 }
 0x2e2   :  { %v330_v31 = vmax.f32 %v322_v16, %v328_v30 }
 0x2e3   :  { %v402_v9 = vld [vmem:[#allocation3] sm:$0xff] }
 0x2e4   :  { %v334_v32 = vsub.f32 %v322_v16, %v330_v31  ;;  %369 = vst.msk [vmem:[#allocation3 + $0x8] sm:$0xff] %vm266_vm0, %v330_v31  ;;  %348 = vperm.xlu1 %489, %v330_v31  }
 0x2e6   :  { %v337_v54 = vmul.f32 1.442695, %v334_v32 }
 0x2e9   :  { %v381_v35 = vpop.permute.xlu2 %380 }
 0x2ea   :  { %vm385_vm3 = vcmp.eq.s32.totalorder %v373_v34, %v381_v35 }
 0x2eb   :  { %v387_v36 = vsel %vm385_vm3, %v314_v8, 0.0 }
 0x2ec   :  { %v389_v37 = vsel %vm318_vm2, %v387_v36, 0.0 }
 0x2f1   :  { %v384_v43 = vpop.permute.xlu2 %383 }
 0x2f2   :  { %vm386_vm4 = vcmp.eq.s32.totalorder %v373_v34, %v384_v43 }
 0x2f3   :  { %v388_v46 = vsel %vm386_vm4, %v316_v21, 0.0 }
 0x2f4   :  { %v392_v49 = vsel %vm318_vm2, %v388_v46, 0.0 }
 0x306   :  { %390 = vadd.xlane.f32.xlu0 %v389_v37 }
 0x34e   :  { %v344_v13 = vpop.permute.xlu0 %343 }
 0x34f   :  { %v351_v38 = vsub.f32 %v314_v8, %v344_v13  ;;  %v403_v8 = vld [vmem:[#allocation3 + $0x8] sm:$0xff] }
 0x351   :  { %v353_v39 = vmul.f32 1.442695, %v351_v38 }
 0x353   :  { %505 = vpow2.f32 %v353_v39 }
 0x356   :  { %v349_v40 = vpop.permute.xlu1 %348 }
 0x357   :  { %v352_v41 = vsub.f32 %v316_v21, %v349_v40 }
 0x359   :  { %v506_v42 = vpop.eup %505  ;;  %v355_v44 = vmul.f32 1.442695, %v352_v41 }
 0x35a   :  { %v357_v45 = vsel %vm318_vm2, %v506_v42, 0.0 }
 0x35b   :  { %507 = vpow2.f32 %v355_v44  ;;  %358 = vadd.xlane.f32.xlu1 %v357_v45 }
 0x35c   :  { %509 = vpow2.f32 %v335_v53 }
 0x35d   :  { %511 = vpow2.f32 %v337_v54 }
 0x361   :  { %v508_v47 = vpop.eup %507 }
 0x362   :  { %v360_v48 = vsel %vm318_vm2, %v508_v47, 0.0  ;;  %v510_v55 = vpop.eup %509 }
 0x363   :  { %361 = vadd.xlane.f32.xlu2 %v360_v48  ;;  %393 = vadd.xlane.f32.xlu1 %v392_v49  ;;  %v339_v57 = vmul.f32 %v510_v55, %v331_v56  ;;  %v512_v60 = vpop.eup %511 }
 0x364   :  { %v340_v63 = vmul.f32 %v512_v60, %v332_v61 }
 0x379   :  { %v391_v51 = vpop.xlane.xlu0 %390 }
 0x37a   :  { %v395_v52 = vadd.f32 %v391_v51, %v377_v50 }
 0x37c   :  { %397 = vst.msk [vmem:[#allocation5] sm:$0xff] %vm266_vm0, %v395_v52 }
 0x383   :  { %v416_v12 = vld [vmem:[#allocation5] sm:$0xff] }
 0x3ce   :  { %v359_v58 = vpop.xlane.xlu1 %358 }
 0x3cf   :  { %v363_v59 = vadd.f32 %v359_v58, %v339_v57 }
 0x3d1   :  { %366 = vst.msk [vmem:[#allocation4] sm:$0xff] %vm266_vm0, %v363_v59 }
 0x3d6   :  { %v394_v0 = vpop.xlane.xlu1 %393  ;;  %v362_v1 = vpop.xlane.xlu2 %361 }
 0x3d7   :  { %v396_v2 = vadd.f32 %v394_v0, %v378_v62  ;;  %v364_v3 = vadd.f32 %v362_v1, %v340_v63 }
 0x3d8   :  { %v404_v4 = vld [vmem:[#allocation4] sm:$0xff] }
 0x3d9   :  { %513 = vlog2.f32 %v404_v4  ;;  %398 = vst.msk [vmem:[#allocation5 + $0x8] sm:$0xff] %vm266_vm0, %v396_v2 }
 0x3da   :  { %367 = vst.msk [vmem:[#allocation4 + $0x8] sm:$0xff] %vm266_vm0, %v364_v3 }
 0x3df   :  { %v514_v5 = vpop.eup %513 }
 0x3e0   :  { %v407_v6 = vmul.f32 0.6931472, %v514_v5  ;;  %v417_v20 = vld [vmem:[#allocation5 + $0x8] sm:$0xff] }
 0x3e1   :  { %v405_v10 = vld [vmem:[#allocation4 + $0x8] sm:$0xff] }
 0x3e2   :  { %v410_v11 = vadd.f32 %v407_v6, %v402_v9  ;;  %515 = vlog2.f32 %v405_v10 }
 0x3e4   :  { %v418_v14 = vsub.f32 %v410_v11, %v416_v12 }
 0x3e6   :  { %v420_v15 = vsel %vm414_vm5, %v418_v14, 0.0 }
 0x3e7   :  { %422 = vst.msk [vmem:[%s753_s9] sm:$0xff] %vm266_vm0, %v420_v15 }
 0x3e8   :  { %v516_v17 = vpop.eup %515 }
 0x3e9   :  { %v409_v18 = vmul.f32 0.6931472, %v516_v17 }
 0x3eb   :  { %v411_v19 = vadd.f32 %v409_v18, %v403_v8 }
 0x3ed   :  { %v419_v21 = vsub.f32 %v411_v19, %v417_v20 }
 0x3ef   :  { %v421_v22 = vsel %vm415_vm6, %v419_v21, 0.0 }
 0x3f0   :  { %423 = vst.msk [vmem:[%s753_s9 + $0x8] sm:$0xff] %vm266_vm0, %v421_v22 }
 0x3f1   :  { %593 = dma.done.wait [#allocation8], 256  }
 0x3f2   :  { %594 = vsyncadd [#allocation8], 4294967040 }
 0x3f3   :  { %445 = vsyncpa [#allocation7], 1 }
 0x3f4   :  { %446 = vsyncpa [#allocation10], 1 }
 0x3f5   :  { %447 = vsyncpa [#allocation8], 1 }

// kernel: tpu_custom_call.1
= control target key start
LH: loop header
LB: loop body
LE: loop exit
PB: predicated region body
PF: predicated region fallthrough
CT: control target
= control target key end

     0   :  { %15 = vsyncpa [#allocation7], 0  ;;  %s744_s0 = inlined_call_operand.vmem [shape: f32[16,32], index: 0, kind: input, shape index: {}]   ;;  %s745_s1 = inlined_call_operand.vmem [shape: s32[16,1], index: 1, kind: input, shape index: {}]   ;;  %s746_s2 = inlined_call_operand.hbm [shape: bf16[32,32], index: 2, kind: input, shape index: {}]   ;;  %s747_s3 = inlined_call_operand.vmem [shape: f32[1,32], index: 3, kind: input, shape index: {}]   ;;  %s748_s4 = inlined_call_operand.vmem [shape: f32[1,32], index: 4, kind: input, shape index: {}]   ;;  %s749_s5 = inlined_call_operand.vmem [shape: f32[1,32], index: 5, kind: input, shape index: {}]   ;;  %s750_s6 = inlined_call_operand.hbm [shape: bf16[32,64], index: 6, kind: input, shape index: {}]   ;;  %s751_s7 = inlined_call_operand.vmem [shape: f32[1,64], index: 7, kind: input, shape index: {}]   ;;  %s752_s8 = inlined_call_operand.hbm [shape: f32[16,64], index: 8, kind: output, shape index: {0}]   ;;  %s753_s9 = inlined_call_operand.vmem [shape: f32[16,1], index: 9, kind: output, shape index: {1}]  }
   0x1   :  { %16 = vsyncpa [#allocation10], 0 }
   0x2   :  { %17 = vsyncpa [#allocation8], 0  ;;  %s26_s11 = sshll.u32 %s746_s2, 4  ;;  %s595_s12 = smov [#allocation6]   ;;  %s27_s11 = int_to_ptr.hbm [resolvable:$true] %s26_s11 }
   0x3   :  { %s28_s13 = sshll.u32 %s595_s12, 4  ;;  %s45_s16 = sshll.u32 %s750_s6, 4  ;;  %s29_s13 = int_to_ptr.vmem [resolvable:$true] %s28_s13  ;;  %s46_s16 = int_to_ptr.hbm [resolvable:$true] %s45_s16 }
   0x4   :  { %s596_s17 = smov 64   ;;  %s597_s18 = smov 4  }
   0x5   :  { %34 = dma.hbm_to_vmem [thread:$0]  %s27_s11, 256, %s29_s13, [#allocation7], %s596_s17, %s596_s17, %s597_s18  }
   0x6   :  { %s598_s19 = smov [#allocation9]  }
   0x7   :  { %s47_s20 = sshll.u32 %s598_s19, 4  ;;  %s48_s20 = int_to_ptr.vmem [resolvable:$true] %s47_s20 }
   0x8   :  { %53 = dma.hbm_to_vmem [thread:$0]  %s46_s16, 256, %s48_s20, [#allocation10], %s596_s17, %s596_s17, %s597_s18  }
   0x9   :  { %589 = dma.done.wait [#allocation7], 256  }
   0xa   :  { %590 = vsyncadd [#allocation7], 4294967040 }
   0xb   :  { %591 = dma.done.wait [#allocation10], 256  }
   0xc   :  { %592 = vsyncadd [#allocation10], 4294967040  ;;  %v473_v0 = vld [vmem:[#allocation6 + $0x8] sm:$0xff]  ;;  %v472_v1 = vld [vmem:[#allocation6] sm:$0xff]  ;;  %vm92_vm0 = vcmask 261120   ;;  %vm263_vm14 = vcmask 257024  }
   0xd   :  { %v69_v2 = vld [vmem:[%s744_s0] sm:$0xff]  ;;  %v70_v3 = vld [vmem:[%s744_s0 + $0x8] sm:$0xff]  ;;  %102 = vmatpush.bf16.msra.mxu0 %v473_v0  ;;  %s430_s12 = sshll.u32 %s752_s8, 4  ;;  %s604_s13 = smov 128   ;;  %s431_s12 = int_to_ptr.hbm [resolvable:$true] %s430_s12 }
   0xe   :  { %v71_v4 = vpack.c.bf16 %v70_v3, %v69_v2  ;;  %v491_v5 = vld [vmem:[%s747_s3] ss:$0 sm:$0xff]  ;;  %s605_s14 = smov 8  }
  0x11   :  { %103 = vmatpush.bf16.msra.mxu0 %v472_v1 }
  0x14   :  { %456 = vmatmul.msk.bf16.vlgmr.msra.gmra.mxu0 %vm92_vm0, %v71_v4 }
  0x91   :  { %v105_v6 = vpop.f32.mrf.mxu0 }
  0x92   :  { %v672_v7 = vadd.f32 %v491_v5, %v105_v6 }
  0x94   :  { %v112_v8 = vmul.f32 0.70710677, %v672_v7 }
  0x96   :  { %v114_v9 = vmul.f32 %v112_v8, %v112_v8 }
  0x98   :  { %v115_v10 = vmin.f32 %v114_v9, 16.0 }
  0x99   :  { %v107_v11 = vpop.f32.mrf.mxu0 }
  0x9a   :  { %v116_v12 = vmul.f32 2.1237322e-06, %v115_v10  ;;  %v675_v13 = vadd.f32 %v491_v5, %v107_v11  ;;  %v127_v14 = vmul.f32 3.8918573e-05, %v115_v10 }
  0x9c   :  { %v117_v15 = vadd.f32 0.00028619796, %v116_v12  ;;  %v678_v16 = vmul.f32 0.70710677, %v675_v13  ;;  %v128_v17 = vadd.f32 0.001143296, %v127_v14 }
  0x9e   :  { %v118_v18 = vmul.f32 %v117_v15, %v115_v10  ;;  %v154_v19 = vmul.f32 %v678_v16, %v678_v16  ;;  %v129_v20 = vmul.f32 %v128_v17, %v115_v10  ;;  %v110_v15 = vmul.f32 0.5, %v672_v7 }
  0xa0   :  { %v155_v21 = vmin.f32 %v154_v19, 16.0  ;;  %v130_v22 = vadd.f32 0.014752088, %v129_v20  ;;  %v119_v23 = vadd.f32 0.0036580483, %v118_v18 }
  0xa2   :  { %v156_v24 = vmul.f32 2.1237322e-06, %v155_v21  ;;  %v167_v25 = vmul.f32 3.8918573e-05, %v155_v21  ;;  %v131_v26 = vmul.f32 %v130_v22, %v115_v10  ;;  %v120_v30 = vmul.f32 %v119_v23, %v115_v10 }
  0xa4   :  { %v157_v27 = vadd.f32 0.00028619796, %v156_v24  ;;  %v168_v28 = vadd.f32 0.001143296, %v167_v25  ;;  %v132_v29 = vadd.f32 0.112945676, %v131_v26 }
  0xa5   :  { %v121_v37 = vadd.f32 0.05243302, %v120_v30  ;;  %v111_v25 = vmul.f32 0.5, %v675_v13 }
  0xa6   :  { %v158_v31 = vmul.f32 %v157_v27, %v155_v21  ;;  %v169_v32 = vmul.f32 %v168_v28, %v155_v21  ;;  %v133_v33 = vmul.f32 %v132_v29, %v115_v10  ;;  %v599_v28 = vmov 32.0  }
  0xa7   :  { %v122_v43 = vmul.f32 %v121_v37, %v115_v10 }
  0xa8   :  { %v170_v34 = vadd.f32 0.014752088, %v169_v32  ;;  %v159_v35 = vadd.f32 0.0036580483, %v158_v31  ;;  %v134_v36 = vadd.f32 0.4994258, %v133_v33 }
  0xa9   :  { %v123_v47 = vadd.f32 0.18741608, %v122_v43 }
  0xaa   :  { %v171_v38 = vmul.f32 %v170_v34, %v155_v21  ;;  %v135_v39 = vmul.f32 %v134_v36, %v115_v10  ;;  %v160_v41 = vmul.f32 %v159_v35, %v155_v21 }
  0xab   :  { %v124_v52 = vmul.f32 %v123_v47, %v115_v10 }
  0xac   :  { %v172_v40 = vadd.f32 0.112945676, %v171_v38  ;;  %v136_v42 = vadd.f32 1.0, %v135_v39  ;;  %v161_v46 = vadd.f32 0.05243302, %v160_v41 }
  0xad   :  { %v125_v57 = vadd.f32 1.1283791, %v124_v52 }
  0xae   :  { %v173_v44 = vmul.f32 %v172_v40, %v155_v21  ;;  %495 = vrcp.f32 %v136_v42  ;;  %v162_v51 = vmul.f32 %v161_v46, %v155_v21  ;;  %v148_v56 = vand.u32 2147483648, %v136_v42  ;;  %v476_v46 = vld [vmem:[#allocation9 + $0x8] sm:$0xff] }
  0xaf   :  { %v146_v59 = vand.u32 2147483647, %v136_v42  ;;  %vm142_vm2 = vweird.f32 %v136_v42  ;;  %v126_v1 = vmul.f32 %v125_v57, %v112_v8  ;;  %310 = vmatpush.bf16.msra.mxu1 %v476_v46 }
  0xb0   :  { %v174_v45 = vadd.f32 0.4994258, %v173_v44  ;;  %v163_v55 = vadd.f32 0.18741608, %v162_v51  ;;  %v149_v63 = vor.u32 1.1754944e-38, %v148_v56 }
  0xb1   :  { %vm147_vm4 = vcmp.eq.f32.partialorder %v146_v59, 8.507059e+37  ;;  %v492_v59 = vld [vmem:[%s748_s4] ss:$0 sm:$0xff] }
  0xb2   :  { %v175_v48 = vmul.f32 %v174_v45, %v155_v21  ;;  %v164_v62 = vmul.f32 %v163_v55, %v155_v21 }
  0xb4   :  { %v176_v49 = vadd.f32 1.0, %v175_v48  ;;  %v496_v50 = vpop.eup %495  ;;  %v165_v9 = vadd.f32 1.1283791, %v164_v62  ;;  %v493_v62 = vld [vmem:[%s749_s5] ss:$0 sm:$0xff] }
  0xb5   :  { %v138_v53 = vmul.f32 %v496_v50, %v136_v42  ;;  %vm143_vm1 = vweird.f32 %v496_v50 }
  0xb6   :  { %497 = vrcp.f32 %v176_v49  ;;  %vm144_vm3 = vmor %vm142_vm2, %vm143_vm1  ;;  %v188_v6 = vand.u32 2147483648, %v176_v49  ;;  %v186_v11 = vand.u32 2147483647, %v176_v49  ;;  %vm182_vm6 = vweird.f32 %v176_v49 }
  0xb7   :  { %v139_v54 = vsub.f32 1.0, %v138_v53  ;;  %v166_v8 = vmul.f32 %v165_v9, %v678_v16  ;;  %499 = vrcp.f32 %v599_v28  ;;  %vm318_vm2 = vcmask 523264  }
  0xb8   :  { %v189_v18 = vor.u32 1.1754944e-38, %v188_v6  ;;  %vm187_vm8 = vcmp.eq.f32.partialorder %v186_v11, 8.507059e+37 }
  0xb9   :  { %v140_v58 = vmul.f32 %v496_v50, %v139_v54 }
  0xbb   :  { %v141_v61 = vadd.f32 %v496_v50, %v140_v58 }
  0xbc   :  { %v498_v60 = vpop.eup %497 }
  0xbd   :  { %v178_v0 = vmul.f32 %v498_v60, %v176_v49  ;;  %v145_v2 = vsel %vm144_vm3, %v496_v50, %v141_v61  ;;  %vm183_vm5 = vweird.f32 %v498_v60  ;;  %v500_v29 = vpop.eup %499  ;;  %v475_v49 = vld [vmem:[#allocation9] sm:$0xff] }
  0xbe   :  { %v150_v3 = vsel %vm147_vm4, %v149_v63, %v145_v2  ;;  %vm184_vm7 = vmor %vm182_vm6, %vm183_vm5  ;;  %v205_v16 = vmul.f32 32.0, %v500_v29  ;;  %vm209_vm9 = vweird.f32 %v500_v29  ;;  %311 = vmatpush.bf16.msra.mxu1 %v475_v49 }
  0xbf   :  { %v179_v4 = vsub.f32 1.0, %v178_v0  ;;  %v151_v5 = vmul.f32 %v150_v3, %v126_v1 }
  0xc0   :  { %v206_v30 = vsub.f32 1.0, %v205_v16 }
  0xc1   :  { %v180_v10 = vmul.f32 %v498_v60, %v179_v4  ;;  %v457_v12 = vclamps-f32 %v151_v5, 1.0 }
  0xc2   :  { %v207_v31 = vmul.f32 %v500_v29, %v206_v30 }
  0xc3   :  { %v181_v14 = vadd.f32 %v498_v60, %v180_v10  ;;  %v194_v17 = vadd.f32 1.0, %v457_v12 }
  0xc4   :  { %v208_v32 = vadd.f32 %v500_v29, %v207_v31 }
  0xc5   :  { %v185_v19 = vsel %vm184_vm7, %v498_v60, %v181_v14  ;;  %v196_v20 = vmul.f32 %v194_v17, %v110_v15  ;;  %v600_v15 = vmov 0   ;;  %v494_v17 = vld [vmem:[%s751_s7] ss:$0 sm:$0xff] }
  0xc6   :  { %v190_v21 = vsel %vm187_vm8, %v189_v18, %v185_v19  ;;  %v210_v33 = vsel %vm209_vm9, %v500_v29, %v208_v32  ;;  %490 = vset.pattern.permute.xlu2 %v600_v15  ;;  %488 = vset.pattern.permute.xlu0 %v600_v15 }
  0xc7   :  { %v191_v22 = vmul.f32 %v190_v21, %v166_v8  ;;  %v198_v23 = vsel %vm92_vm0, %v196_v20, 0.0  ;;  %489 = vset.pattern.permute.xlu1 %v600_v15 }
  0xc8   :  { %199 = vadd.xlane.f32.xlu0 %v198_v23  ;;  %v601_v23 = vmov -inf  }
  0xc9   :  { %v458_v24 = vclamps-f32 %v191_v22, 1.0 }
  0xcb   :  { %v195_v26 = vadd.f32 1.0, %v458_v24  ;;  %v708_v24 = vld [vmem:[%s745_s1] sm:$0xff] }
  0xcc   :  { %vm414_vm5 = vcmp.ne.s32.totalorder %v708_v24, 4294967196 }
  0xcd   :  { %v197_v27 = vmul.f32 %v195_v26, %v111_v25  ;;  %v714_v25 = vld [vmem:[%s745_s1 + $0x8] sm:$0xff]  ;;  %v602_v26 = vmov 0.0   ;;  %s603_s1 = smov [#allocation11]  }
  0xce   :  { %s428_s30 = sshll.u32 %s603_s1, 4  ;;  %vm415_vm6 = vcmp.ne.s32.totalorder %v714_v25, 4294967196  ;;  %s429_s30 = int_to_ptr.vmem [resolvable:$true] %s428_s30 }
  0xcf   :  { %v201_v7 = vsel %vm92_vm0, %v197_v27, 0.0 }
  0xd0   :  { %202 = vadd.xlane.f32.xlu0 %v201_v7 }
 0x13b   :  { %v200_v34 = vpop.xlane.xlu0 %199 }
 0x13c   :  { %v211_v35 = vmul.f32 %v210_v33, %v200_v34 }
 0x13e   :  { %v213_v36 = vsub.f32 %v196_v20, %v211_v35 }
 0x140   :  { %v215_v37 = vmul.f32 %v213_v36, %v213_v36 }
 0x142   :  { %v217_v13 = vsel %vm92_vm0, %v215_v37, 0.0 }
 0x143   :  { %218 = vadd.xlane.f32.xlu1 %v217_v13  ;;  %v203_v38 = vpop.xlane.xlu0 %202 }
 0x144   :  { %v212_v39 = vmul.f32 %v210_v33, %v203_v38 }
 0x146   :  { %v214_v40 = vsub.f32 %v197_v27, %v212_v39 }
 0x148   :  { %v216_v41 = vmul.f32 %v214_v40, %v214_v40 }
 0x14a   :  { %v220_v42 = vsel %vm92_vm0, %v216_v41, 0.0 }
 0x14b   :  { %221 = vadd.xlane.f32.xlu1 %v220_v42 }
 0x1b6   :  { %v219_v43 = vpop.xlane.xlu1 %218 }
 0x1b7   :  { %v223_v44 = vmul.f32 %v219_v43, %v210_v33 }
 0x1b9   :  { %v225_v45 = vadd.f32 1e-12, %v223_v44 }
 0x1bb   :  { %501 = vrsqrt.f32 %v225_v45  ;;  %vm233_vm11 = vweird.f32 %v225_v45 }
 0x1be   :  { %v222_v47 = vpop.xlane.xlu1 %221 }
 0x1bf   :  { %v224_v48 = vmul.f32 %v222_v47, %v210_v33  ;;  %v372_v33 = vlaneseq }
 0x1c1   :  { %v502_v50 = vpop.eup %501  ;;  %v226_v51 = vadd.f32 1e-12, %v224_v48  ;;  %v373_v34 = vand.u32 127, %v372_v33 }
 0x1c2   :  { %v228_v52 = vmul.f32 %v502_v50, %v225_v45  ;;  %vm234_vm10 = vweird.f32 %v502_v50 }
 0x1c3   :  { %503 = vrsqrt.f32 %v226_v51  ;;  %vm235_vm12 = vmor %vm233_vm11, %vm234_vm10  ;;  %vm243_vm15 = vweird.f32 %v226_v51 }
 0x1c4   :  { %v229_v53 = vmul.f32 %v502_v50, %v228_v52 }
 0x1c6   :  { %v230_v54 = vmul.f32 0.5, %v229_v53 }
 0x1c8   :  { %v231_v55 = vsub.f32 1.5, %v230_v54 }
 0x1c9   :  { %v504_v56 = vpop.eup %503 }
 0x1ca   :  { %v232_v57 = vmul.f32 %v502_v50, %v231_v55  ;;  %v238_v58 = vmul.f32 %v504_v56, %v226_v51  ;;  %vm244_vm13 = vweird.f32 %v504_v56 }
 0x1cb   :  { %vm245_vm1 = vmor %vm243_vm15, %vm244_vm13 }
 0x1cc   :  { %v236_v60 = vsel %vm235_vm12, %v502_v50, %v232_v57  ;;  %v239_v61 = vmul.f32 %v504_v56, %v238_v58 }
 0x1cd   :  { %v247_v63 = vmul.f32 %v236_v60, %v213_v36 }
 0x1ce   :  { %v240_v0 = vmul.f32 0.5, %v239_v61 }
 0x1cf   :  { %v253_v1 = vmul.f32 %v492_v59, %v247_v63 }
 0x1d0   :  { %v241_v2 = vsub.f32 1.5, %v240_v0 }
 0x1d1   :  { %v259_v3 = vadd.f32 %v493_v62, %v253_v1 }
 0x1d2   :  { %v242_v4 = vmul.f32 %v504_v56, %v241_v2 }
 0x1d3   :  { %v261_v5 = vpack.c.bf16 %v259_v3, %v259_v3 }
 0x1d4   :  { %v246_v6 = vsel %vm245_vm1, %v504_v56, %v242_v4 }
 0x1d5   :  { %264 = vst.msk [vmem:[#allocation2] sm:$0xf] %vm263_vm14, %v261_v5  ;;  %v248_v9 = vmul.f32 %v246_v6, %v214_v40 }
 0x1d7   :  { %v254_v10 = vmul.f32 %v492_v59, %v248_v9 }
 0x1d9   :  { %v260_v11 = vadd.f32 %v493_v62, %v254_v10 }
 0x1db   :  { %v262_v12 = vpack.c.bf16 %v260_v11, %v260_v11 }
 0x1dd   :  { %265 = vst.msk [vmem:[#allocation2 + $0x4] sm:$0xf] %vm263_vm14, %v262_v12 }
 0x1e4   :  { %v474_v14 = vld [vmem:[#allocation2] sm:$0xff] }
 0x1e5   :  { %471 = vmatmul.msk.bf16.vlgmr.msra.gmra.mxu1 %vm92_vm0, %v474_v14  ;;  %vm266_vm0 = vcmask 7168  }
 0x1e6   :  { %267 = vst.msk [vmem:[#allocation3] sm:$0xff] %vm266_vm0, %v601_v23 }
 0x1e7   :  { %268 = vst.msk [vmem:[#allocation3 + $0x8] sm:$0xff] %vm266_vm0, %v601_v23 }
 0x1e8   :  { %271 = vst.msk [vmem:[#allocation5] sm:$0xff] %vm266_vm0, %v602_v26 }
 0x1e9   :  { %269 = vst.msk [vmem:[#allocation4] sm:$0xff] %vm266_vm0, %v602_v26 }
 0x1ea   :  { %270 = vst.msk [vmem:[#allocation4 + $0x8] sm:$0xff] %vm266_vm0, %v602_v26 }
 0x1eb   :  { %272 = vst.msk [vmem:[#allocation5 + $0x8] sm:$0xff] %vm266_vm0, %v602_v26 }
 0x1ed   :  { %v321_v27 = vld [vmem:[#allocation3] sm:$0xff] }
 0x1ee   :  { %v322_v16 = vld [vmem:[#allocation3 + $0x8] sm:$0xff] }
 0x1ef   :  { %v377_v50 = vld [vmem:[#allocation5] sm:$0xff] }
 0x1f0   :  { %v331_v56 = vld [vmem:[#allocation4] sm:$0xff] }
 0x1f1   :  { %v332_v61 = vld [vmem:[#allocation4 + $0x8] sm:$0xff] }
 0x1f2   :  { %v378_v62 = vld [vmem:[#allocation5 + $0x8] sm:$0xff] }
 0x262   :  { %v313_v18 = vpop.f32.mrf.mxu1 }
 0x263   :  { %v314_v8 = vadd.f32 %v494_v17, %v313_v18 }
 0x265   :  { %319 = vst.msk [vmem:[#allocation11] sm:$0xff] %vm318_vm2, %v314_v8  ;;  %v323_v19 = vsel %vm318_vm2, %v314_v8, -inf }
 0x266   :  { %324 = vmax.xlane.f32.xlu2 %v323_v19 }
 0x26a   :  { %v315_v20 = vpop.f32.mrf.mxu1 }
 0x26b   :  { %v316_v21 = vadd.f32 %v494_v17, %v315_v20 }
 0x26d   :  { %320 = vst.msk [vmem:[#allocation11 + $0x8] sm:$0xff] %vm318_vm2, %v316_v21  ;;  %v326_v22 = vsel %vm318_vm2, %v316_v21, -inf }
 0x26e   :  { %327 = vmax.xlane.f32.xlu2 %v326_v22  ;;  %436 = dma.vmem_to_hbm [thread:$0]  %s429_s30, 256, %s431_s12, [#allocation8], %s604_s13, %s604_s13, %s605_s14  }
 0x286   :  { %380 = vperm.xlu2 %490, %v708_v24  }
 0x28e   :  { %383 = vperm.xlu2 %490, %v714_v25  }
 0x2d9   :  { %v325_v7 = vpop.xlane.xlu2 %324 }
 0x2da   :  { %v329_v28 = vmax.f32 %v321_v27, %v325_v7 }
 0x2dc   :  { %v333_v29 = vsub.f32 %v321_v27, %v329_v28  ;;  %368 = vst.msk [vmem:[#allocation3] sm:$0xff] %vm266_vm0, %v329_v28  ;;  %343 = vperm.xlu0 %488, %v329_v28  }
 0x2de   :  { %v335_v53 = vmul.f32 1.442695, %v333_v29 }
 0x2e1   :  { %v328_v30 = vpop.xlane.xlu2 %327 }
 0x2e2   :  { %v330_v31 = vmax.f32 %v322_v16, %v328_v30 }
 0x2e3   :  { %v402_v9 = vld [vmem:[#allocation3] sm:$0xff] }
 0x2e4   :  { %v334_v32 = vsub.f32 %v322_v16, %v330_v31  ;;  %369 = vst.msk [vmem:[#allocation3 + $0x8] sm:$0xff] %vm266_vm0, %v330_v31  ;;  %348 = vperm.xlu1 %489, %v330_v31  }
 0x2e6   :  { %v337_v54 = vmul.f32 1.442695, %v334_v32 }
 0x2e9   :  { %v381_v35 = vpop.permute.xlu2 %380 }
 0x2ea   :  { %vm385_vm3 = vcmp.eq.s32.totalorder %v373_v34, %v381_v35 }
 0x2eb   :  { %v387_v36 = vsel %vm385_vm3, %v314_v8, 0.0 }
 0x2ec   :  { %v389_v37 = vsel %vm318_vm2, %v387_v36, 0.0 }
 0x2f1   :  { %v384_v43 = vpop.permute.xlu2 %383 }
 0x2f2   :  { %vm386_vm4 = vcmp.eq.s32.totalorder %v373_v34, %v384_v43 }
 0x2f3   :  { %v388_v46 = vsel %vm386_vm4, %v316_v21, 0.0 }
 0x2f4   :  { %v392_v49 = vsel %vm318_vm2, %v388_v46, 0.0 }
 0x306   :  { %390 = vadd.xlane.f32.xlu0 %v389_v37 }
 0x34e   :  { %v344_v13 = vpop.permute.xlu0 %343 }
 0x34f   :  { %v351_v38 = vsub.f32 %v314_v8, %v344_v13  ;;  %v403_v8 = vld [vmem:[#allocation3 + $0x8] sm:$0xff] }
 0x351   :  { %v353_v39 = vmul.f32 1.442695, %v351_v38 }
 0x353   :  { %505 = vpow2.f32 %v353_v39 }
 0x356   :  { %v349_v40 = vpop.permute.xlu1 %348 }
 0x357   :  { %v352_v41 = vsub.f32 %v316_v21, %v349_v40 }
 0x359   :  { %v506_v42 = vpop.eup %505  ;;  %v355_v44 = vmul.f32 1.442695, %v352_v41 }
 0x35a   :  { %v357_v45 = vsel %vm318_vm2, %v506_v42, 0.0 }
 0x35b   :  { %507 = vpow2.f32 %v355_v44  ;;  %358 = vadd.xlane.f32.xlu1 %v357_v45 }
 0x35c   :  { %509 = vpow2.f32 %v335_v53 }
 0x35d   :  { %511 = vpow2.f32 %v337_v54 }
 0x361   :  { %v508_v47 = vpop.eup %507 }
 0x362   :  { %v360_v48 = vsel %vm318_vm2, %v508_v47, 0.0  ;;  %v510_v55 = vpop.eup %509 }
 0x363   :  { %361 = vadd.xlane.f32.xlu2 %v360_v48  ;;  %393 = vadd.xlane.f32.xlu1 %v392_v49  ;;  %v339_v57 = vmul.f32 %v510_v55, %v331_v56  ;;  %v512_v60 = vpop.eup %511 }
 0x364   :  { %v340_v63 = vmul.f32 %v512_v60, %v332_v61 }
 0x379   :  { %v391_v51 = vpop.xlane.xlu0 %390 }
 0x37a   :  { %v395_v52 = vadd.f32 %v391_v51, %v377_v50 }
 0x37c   :  { %397 = vst.msk [vmem:[#allocation5] sm:$0xff] %vm266_vm0, %v395_v52 }
 0x383   :  { %v416_v12 = vld [vmem:[#allocation5] sm:$0xff] }
 0x3ce   :  { %v359_v58 = vpop.xlane.xlu1 %358 }
 0x3cf   :  { %v363_v59 = vadd.f32 %v359_v58, %v339_v57 }
 0x3d1   :  { %366 = vst.msk [vmem:[#allocation4] sm:$0xff] %vm266_vm0, %v363_v59 }
 0x3d6   :  { %v394_v0 = vpop.xlane.xlu1 %393  ;;  %v362_v1 = vpop.xlane.xlu2 %361 }
 0x3d7   :  { %v396_v2 = vadd.f32 %v394_v0, %v378_v62  ;;  %v364_v3 = vadd.f32 %v362_v1, %v340_v63 }
 0x3d8   :  { %v404_v4 = vld [vmem:[#allocation4] sm:$0xff] }
 0x3d9   :  { %513 = vlog2.f32 %v404_v4  ;;  %398 = vst.msk [vmem:[#allocation5 + $0x8] sm:$0xff] %vm266_vm0, %v396_v2 }
 0x3da   :  { %367 = vst.msk [vmem:[#allocation4 + $0x8] sm:$0xff] %vm266_vm0, %v364_v3 }
 0x3df   :  { %v514_v5 = vpop.eup %513 }
 0x3e0   :  { %v407_v6 = vmul.f32 0.6931472, %v514_v5  ;;  %v417_v20 = vld [vmem:[#allocation5 + $0x8] sm:$0xff] }
 0x3e1   :  { %v405_v10 = vld [vmem:[#allocation4 + $0x8] sm:$0xff] }
 0x3e2   :  { %v410_v11 = vadd.f32 %v407_v6, %v402_v9  ;;  %515 = vlog2.f32 %v405_v10 }
 0x3e4   :  { %v418_v14 = vsub.f32 %v410_v11, %v416_v12 }
 0x3e6   :  { %v420_v15 = vsel %vm414_vm5, %v418_v14, 0.0 }
 0x3e7   :  { %422 = vst.msk [vmem:[%s753_s9] sm:$0xff] %vm266_vm0, %v420_v15 }
 0x3e8   :  { %v516_v17 = vpop.eup %515 }
 0x3e9   :  { %v409_v18 = vmul.f32 0.6931472, %v516_v17 }
 0x3eb   :  { %v411_v19 = vadd.f32 %v409_v18, %v403_v8 }
 0x3ed   :  { %v419_v21 = vsub.f32 %v411_v19, %v417_v20 }
 0x3ef   :  { %v421_v22 = vsel %vm415_vm6, %v419_v21, 0.0 }
 0x3f0   :  { %423 = vst.msk [vmem:[%s753_s9 + $0x8] sm:$0xff] %vm266_vm0, %v421_v22 }
 0x3f1   :  { %593 = dma.done.wait [#allocation8], 256  }
 0x3f2   :  { %594 = vsyncadd [#allocation8], 4294967040 }
 0x3f3   :  { %445 = vsyncpa [#allocation7], 1 }
 0x3f4   :  { %446 = vsyncpa [#allocation10], 1 }
 0x3f5   :  { %447 = vsyncpa [#allocation8], 1 }

</bundles_post_ra>
